<compile_context>
chip_gen: v7x
topology: tpu7x:2x2x1
jax: 0.10.0
libtpu: 0.0.40
codegen_flags: <defaults>
</compile_context>

<pallas_src>
import functools

import jax
import jax.numpy as jnp
import numpy as np
from jax.experimental import pallas as pl
from jax.experimental.pallas import tpu as pltpu

_EPS = 1e-5


# ----------------------------------------------------------------------------
# Wrapper-side weight re-packing (tiny one-time XLA work).
# ----------------------------------------------------------------------------
def _banded_conv3x3_weights(w_oihw, W):
    """OIHW 3x3 weights -> (3, W*Cin, W*Cout) banded matrices, one per kh.

    In the lane-dense layout an image row is the length-(W*Cin) vector
    x_row[w*Cin + c].  For kernel row kh:
        y_row[w*Cout + o] = sum_p x_row[p] * B[kh][p, w*Cout + o]
    with the kw taps and the 'same' zero padding along W folded into B.
    """
    Cout, Cin, KH, KW = w_oihw.shape
    w_hwio = jnp.transpose(w_oihw, (2, 3, 1, 0)).astype(jnp.float32)  # (3,3,Ci,Co)
    sel = np.zeros((KW, W, W), np.float32)  # sel[kw, src, w] = 1 iff src == w+kw-1
    for kw in range(KW):
        for w in range(W):
            src = w + kw - 1
            if 0 <= src < W:
                sel[kw, src, w] = 1.0
    banded = jnp.einsum("kpw,hkco->hpcwo", jnp.asarray(sel), w_hwio)
    return banded.reshape(KH, W * Cin, W * Cout)


def _blockdiag_conv1x1_weights(w_oihw, W):
    """OIHW 1x1 weights -> (W*Cin, W*Cout) block-diagonal matrix."""
    w_io = jnp.transpose(w_oihw[:, :, 0, 0], (1, 0)).astype(jnp.float32)  # (Ci,Co)
    eye = jnp.asarray(np.eye(W, dtype=np.float32))
    return jnp.einsum("pw,co->pcwo", eye, w_io).reshape(
        W * w_io.shape[0], W * w_io.shape[1])


def _fold_bn(sum_t, sumsq_t, gamma, beta, count, W, Cout):
    """Per-tile sum/sumsq partials -> folded per-lane (scale, shift) rows."""
    s = jnp.sum(sum_t.reshape(-1, W, Cout), axis=(0, 1))
    ss = jnp.sum(sumsq_t.reshape(-1, W, Cout), axis=(0, 1))
    mean = s / count
    var = ss / count - mean * mean               # biased var (training-mode BN)
    scale = gamma.astype(jnp.float32) * jax.lax.rsqrt(var + _EPS)
    shift = beta.astype(jnp.float32) - mean * scale
    return (jnp.tile(scale, W).reshape(1, W * Cout),
            jnp.tile(shift, W).reshape(1, W * Cout))


# ----------------------------------------------------------------------------
# Kernels.
# ----------------------------------------------------------------------------
def _conv1_kernel(xh_ref, b1_ref, y1_ref, s_ref, ss_ref, *, dot_dtype):
    """conv_1 (no bias - cancelled by BN) + partial BN-1 statistics."""
    bn, H, wcout = y1_ref.shape
    wcin = xh_ref.shape[-1]
    rows = bn * H
    acc = jnp.zeros((rows, wcout), jnp.float32)
    for kh in range(3):                                   # 3 fused MXU matmuls
        slab = xh_ref[:, kh:kh + H, :].reshape(rows, wcin).astype(dot_dtype)
        acc += jnp.dot(slab, b1_ref[kh], preferred_element_type=jnp.float32)
    y1_ref[...] = acc.reshape(bn, H, wcout)
    s_ref[...] = jnp.sum(acc, axis=0, keepdims=True).reshape(1, 1, wcout)
    ss_ref[...] = jnp.sum(acc * acc, axis=0, keepdims=True).reshape(1, 1, wcout)


def _conv2_kernel(y1_ref, sc1_ref, sh1_ref, b2_ref, y2_ref, s_ref, ss_ref,
                  a1p_ref, *, dot_dtype):
    """bn_1 (folded) + relu_1 + conv_2 + partial BN-2 statistics."""
    bn, H, wcout = y2_ref.shape
    rows = bn * H
    # BN1 + ReLU, lane-dense on (bn*H, W*Cout).
    a1 = jnp.maximum(
        y1_ref[...].reshape(rows, wcout) * sc1_ref[...] + sh1_ref[...], 0.0)
    # 'same' padding along H only: zero the two 1-row halos, write the interior.
    a1p_ref[:, 0:1, :] = jnp.zeros((bn, 1, wcout), jnp.float32)
    a1p_ref[:, H + 1:H + 2, :] = jnp.zeros((bn, 1, wcout), jnp.float32)
    a1p_ref[:, 1:H + 1, :] = a1.reshape(bn, H, wcout)
    acc = jnp.zeros((rows, wcout), jnp.float32)
    for kh in range(3):
        slab = a1p_ref[:, kh:kh + H, :].reshape(rows, wcout).astype(dot_dtype)
        acc += jnp.dot(slab, b2_ref[kh], preferred_element_type=jnp.float32)
    y2_ref[...] = acc.reshape(bn, H, wcout)
    s_ref[...] = jnp.sum(acc, axis=0, keepdims=True).reshape(1, 1, wcout)
    ss_ref[...] = jnp.sum(acc * acc, axis=0, keepdims=True).reshape(1, 1, wcout)


def _residual_out_kernel(y2_ref, xh_ref, bd_ref, b1x1_ref, sc2_ref, sh2_ref,
                         out_ref, *, dot_dtype):
    """bn_2 (folded) + 1x1-conv residual + relu_2, fully lane-dense."""
    bn, H, wcout = out_ref.shape
    wcin = xh_ref.shape[-1]
    rows = bn * H
    # Residual path: 1x1 conv as a block-diagonal matmul on the same layout.
    x = xh_ref[:, 1:H + 1, :].reshape(rows, wcin).astype(dot_dtype)
    res = jnp.dot(x, bd_ref[...], preferred_element_type=jnp.float32) + b1x1_ref[...]
    # Main path: BN2 (folded scale/shift), then relu_2(residual + main).
    h = y2_ref[...].reshape(rows, wcout) * sc2_ref[...] + sh2_ref[...]
    out_ref[...] = jnp.maximum(res + h, 0.0).reshape(bn, H, wcout)


# ----------------------------------------------------------------------------
# Wrapper.
# ----------------------------------------------------------------------------
def resnet_block(x_nchw, params, *, block_n=1, dot_dtype=jnp.bfloat16):
    """Forward pass of ResNetBlock; input/output are NCHW (PyTorch layout)."""
    N, Cin, H, W = x_nchw.shape
    Cout = params["w1"].shape[0]
    assert N % block_n == 0, "batch must be divisible by block_n"
    T = N // block_n
    wcin, wcout = W * Cin, W * Cout
    nhw = N * H * W

    # NCHW -> lane-dense (N, H+2, W*Cin); padded along H only (W padding is
    # folded into the banded weight matrices).
    x_nhwc = jnp.transpose(x_nchw, (0, 2, 3, 1)).astype(jnp.float32)
    xh = jnp.pad(x_nhwc, ((0, 0), (1, 1), (0, 0), (0, 0))).reshape(N, H + 2, wcin)

    b1m = _banded_conv3x3_weights(params["w1"], W).astype(dot_dtype)       # (3, W*Ci, W*Co)
    b2m = _banded_conv3x3_weights(params["w2"], W).astype(dot_dtype)       # (3, W*Co, W*Co)
    bdm = _blockdiag_conv1x1_weights(params["w1x1"], W).astype(dot_dtype)  # (W*Ci, W*Co)
    b1x1_t = jnp.tile(params["b1x1"].astype(jnp.float32), W).reshape(1, wcout)
    # NOTE: conv_1 / conv_2 biases are intentionally dropped: a conv bias that
    # feeds training-mode BatchNorm is exactly cancelled by the mean subtraction.

    cp = pltpu.CompilerParams(dimension_semantics=("parallel",),
                              vmem_limit_bytes=64 * 1024 * 1024)

    img_in = lambda c: pl.BlockSpec((block_n, H + 2, c), lambda i: (i, 0, 0))
    img_out = lambda c: pl.BlockSpec((block_n, H, c), lambda i: (i, 0, 0))
    whole = lambda shape: pl.BlockSpec(shape, lambda i, s=shape: (0,) * len(s))
    stat_spec = pl.BlockSpec((1, 1, wcout), lambda i: (i, 0, 0))
    stat_shape = jax.ShapeDtypeStruct((T, 1, wcout), jnp.float32)
    act_shape = jax.ShapeDtypeStruct((N, H, wcout), jnp.float32)

    # --- kernel A: conv_1 + BN-1 partial statistics --------------------------
    y1, s1, ss1 = pl.pallas_call(
        functools.partial(_conv1_kernel, dot_dtype=dot_dtype),
        grid=(T,),
        in_specs=[img_in(wcin), whole(b1m.shape)],
        out_specs=[img_out(wcout), stat_spec, stat_spec],
        out_shape=[act_shape, stat_shape, stat_shape],
        compiler_params=cp,
    )(xh, b1m)
    sc1, sh1 = _fold_bn(s1, ss1, params["g1"], params["be1"], nhw, W, Cout)

    # --- kernel B: bn_1 + relu_1 + conv_2 + BN-2 partial statistics ----------
    y2, s2, ss2 = pl.pallas_call(
        functools.partial(_conv2_kernel, dot_dtype=dot_dtype),
        grid=(T,),
        in_specs=[img_out(wcout), whole(sc1.shape), whole(sh1.shape),
                  whole(b2m.shape)],
        out_specs=[img_out(wcout), stat_spec, stat_spec],
        out_shape=[act_shape, stat_shape, stat_shape],
        scratch_shapes=[pltpu.VMEM((block_n, H + 2, wcout), jnp.float32)],
        compiler_params=cp,
    )(y1, sc1, sh1, b2m)
    sc2, sh2 = _fold_bn(s2, ss2, params["g2"], params["be2"], nhw, W, Cout)

    # --- kernel C: bn_2 + 1x1-conv residual + relu_2 --------------------------
    out_l = pl.pallas_call(
        functools.partial(_residual_out_kernel, dot_dtype=dot_dtype),
        grid=(T,),
        in_specs=[img_out(wcout), img_in(wcin), whole(bdm.shape),
                  whole(b1x1_t.shape), whole(sc2.shape), whole(sh2.shape)],
        out_specs=img_out(wcout),
        out_shape=act_shape,
        compiler_params=cp,
    )(y2, xh, bdm, b1x1_t, sc2, sh2)

    return jnp.transpose(out_l.reshape(N, H, W, Cout), (0, 3, 1, 2))


# ----------------------------------------------------------------------------
# Plain-XLA reference (for correctness check).
# ----------------------------------------------------------------------------
def _reference(x_nchw, p, dot_dtype=jnp.bfloat16):
    """Reference forward pass.  Conv operands are rounded to `dot_dtype`
    (f32 accumulation), mirroring the kernel's MXU fast path, so the check
    isolates kernel structure from bf16 operand quantisation.  Conv biases
    b1/b2 are included here to demonstrate that dropping them in the kernel
    (before training-mode BN) is equivalent."""
    x = jnp.transpose(x_nchw, (0, 2, 3, 1)).astype(jnp.float32)

    def conv(h, w_oihw, b, padding):
        w = jnp.transpose(w_oihw, (2, 3, 1, 0))
        y = jax.lax.conv_general_dilated(
            h.astype(dot_dtype), w.astype(dot_dtype), (1, 1), padding,
            dimension_numbers=("NHWC", "HWIO", "NHWC"),
            preferred_element_type=jnp.float32)
        return y + b.reshape(1, 1, 1, -1).astype(jnp.float32)

    def bn(y, g, b):
        m = jnp.mean(y, axis=(0, 1, 2), keepdims=True)
        v = jnp.var(y, axis=(0, 1, 2), keepdims=True)
        return ((y - m) * jax.lax.rsqrt(v + _EPS) * g.reshape(1, 1, 1, -1)
                + b.reshape(1, 1, 1, -1))

    res = conv(x, p["w1x1"], p["b1x1"], "VALID")
    h = jax.nn.relu(bn(conv(x, p["w1"], p["b1"], "SAME"), p["g1"], p["be1"]))
    h = bn(conv(h, p["w2"], p["b2"], "SAME"), p["g2"], p["be2"])
    return jnp.transpose(jax.nn.relu(res + h), (0, 3, 1, 2))


if __name__ == "__main__":
    N, Cin, Cout, H, W = 2, 4, 8, 16, 16

    key = jax.random.PRNGKey(0)
    keys = jax.random.split(key, 11)
    params = {
        "w1":   0.1 * jax.random.normal(keys[0], (Cout, Cin, 3, 3), jnp.float32),
        "b1":   0.1 * jax.random.normal(keys[1], (Cout,), jnp.float32),
        "w2":   0.1 * jax.random.normal(keys[2], (Cout, Cout, 3, 3), jnp.float32),
        "b2":   0.1 * jax.random.normal(keys[3], (Cout,), jnp.float32),
        "w1x1": 0.1 * jax.random.normal(keys[4], (Cout, Cin, 1, 1), jnp.float32),
        "b1x1": 0.1 * jax.random.normal(keys[5], (Cout,), jnp.float32),
        "g1":   1.0 + 0.1 * jax.random.normal(keys[6], (Cout,), jnp.float32),
        "be1":  0.1 * jax.random.normal(keys[7], (Cout,), jnp.float32),
        "g2":   1.0 + 0.1 * jax.random.normal(keys[8], (Cout,), jnp.float32),
        "be2":  0.1 * jax.random.normal(keys[9], (Cout,), jnp.float32),
    }
    x = jax.random.normal(keys[10], (N, Cin, H, W), jnp.float32)

    fwd = jax.jit(functools.partial(resnet_block, block_n=1))
    out = jax.block_until_ready(fwd(x, params))
    ref = jax.block_until_ready(_reference(x, params))

    assert out.shape == (N, Cout, H, W), out.shape
    err = float(jnp.max(jnp.abs(out - ref)))
    assert err < 1e-2, f"max abs error too large: {err}"
    print("KERNEL_OK")
</pallas_src>

<mosaic_0001>
module attributes {stable_mosaic.version = 11 : i64} {
  func.func @_conv1_kernel(%arg0: i32, %arg1: memref<1x18x64xf32, #tpu.memory_space<vmem>>, %arg2: memref<3x64x128xbf16, #tpu.memory_space<vmem>>, %arg3: memref<1x16x128xf32, #tpu.memory_space<vmem>>, %arg4: memref<1x1x128xf32, #tpu.memory_space<vmem>>, %arg5: memref<1x1x128xf32, #tpu.memory_space<vmem>>) attributes {dimension_semantics = [#tpu.dimension_semantics<parallel>], iteration_bounds = array<i64: 2>, scalar_prefetch = 0 : i64, scratch_operands = 0 : i64, tpu.core_type = #tpu.core_type<tc>, window_params = [{transform_indices = @transform_0, window_bounds = array<i64: 1, 18, 64>}, {pipeline_mode = #tpu.pipeline_mode<synchronous>, transform_indices = @transform_1, window_bounds = array<i64: 3, 64, 128>}, {transform_indices = @transform_2, window_bounds = array<i64: 1, 16, 128>}, {transform_indices = @transform_3, window_bounds = array<i64: 1, 1, 128>}, {transform_indices = @transform_4, window_bounds = array<i64: 1, 1, 128>}]} {
    %cst = arith.constant 0.000000e+00 : f32
    %0 = vector.broadcast %cst : f32 to vector<16x128xf32>
    %c0 = arith.constant 0 : index
    %c0_0 = arith.constant 0 : index
    %c0_1 = arith.constant 0 : index
    %1 = vector.load %arg1[%c0, %c0_0, %c0_1] : memref<1x18x64xf32, #tpu.memory_space<vmem>>, vector<1x16x64xf32>
    %2 = vector.shape_cast %1 : vector<1x16x64xf32> to vector<16x64xf32>
    %3 = arith.truncf %2 : vector<16x64xf32> to vector<16x64xbf16>
    %c0_2 = arith.constant 0 : index
    %c0_3 = arith.constant 0 : index
    %c0_4 = arith.constant 0 : index
    %4 = vector.load %arg2[%c0_2, %c0_3, %c0_4] : memref<3x64x128xbf16, #tpu.memory_space<vmem>>, vector<1x64x128xbf16>
    %5 = vector.shape_cast %4 : vector<1x64x128xbf16> to vector<64x128xbf16>
    %cst_5 = arith.constant dense<0.000000e+00> : vector<16x128xf32>
    %6 = tpu.matmul %3, %5, %cst_5 {dimension_numbers = #tpu.dot_dimension_numbers<[1], [0], [0], [1], [0, 0, 1, 1], [], []>} : vector<16x64xbf16>, vector<64x128xbf16>, vector<16x128xf32> -> vector<16x128xf32>
    %7 = arith.addf %0, %6 : vector<16x128xf32>
    %c0_6 = arith.constant 0 : index
    %c1 = arith.constant 1 : index
    %c0_7 = arith.constant 0 : index
    %8 = vector.load %arg1[%c0_6, %c1, %c0_7] : memref<1x18x64xf32, #tpu.memory_space<vmem>>, vector<1x16x64xf32>
    %9 = vector.shape_cast %8 : vector<1x16x64xf32> to vector<16x64xf32>
    %10 = arith.truncf %9 : vector<16x64xf32> to vector<16x64xbf16>
    %c1_8 = arith.constant 1 : index
    %c0_9 = arith.constant 0 : index
    %c0_10 = arith.constant 0 : index
    %11 = vector.load %arg2[%c1_8, %c0_9, %c0_10] : memref<3x64x128xbf16, #tpu.memory_space<vmem>>, vector<1x64x128xbf16>
    %12 = vector.shape_cast %11 : vector<1x64x128xbf16> to vector<64x128xbf16>
    %cst_11 = arith.constant dense<0.000000e+00> : vector<16x128xf32>
    %13 = tpu.matmul %10, %12, %cst_11 {dimension_numbers = #tpu.dot_dimension_numbers<[1], [0], [0], [1], [0, 0, 1, 1], [], []>} : vector<16x64xbf16>, vector<64x128xbf16>, vector<16x128xf32> -> vector<16x128xf32>
    %14 = arith.addf %7, %13 : vector<16x128xf32>
    %c0_12 = arith.constant 0 : index
    %c2 = arith.constant 2 : index
    %c0_13 = arith.constant 0 : index
    %15 = vector.load %arg1[%c0_12, %c2, %c0_13] : memref<1x18x64xf32, #tpu.memory_space<vmem>>, vector<1x16x64xf32>
    %16 = vector.shape_cast %15 : vector<1x16x64xf32> to vector<16x64xf32>
    %17 = arith.truncf %16 : vector<16x64xf32> to vector<16x64xbf16>
    %c2_14 = arith.constant 2 : index
    %c0_15 = arith.constant 0 : index
    %c0_16 = arith.constant 0 : index
    %18 = vector.load %arg2[%c2_14, %c0_15, %c0_16] : memref<3x64x128xbf16, #tpu.memory_space<vmem>>, vector<1x64x128xbf16>
    %19 = vector.shape_cast %18 : vector<1x64x128xbf16> to vector<64x128xbf16>
    %cst_17 = arith.constant dense<0.000000e+00> : vector<16x128xf32>
    %20 = tpu.matmul %17, %19, %cst_17 {dimension_numbers = #tpu.dot_dimension_numbers<[1], [0], [0], [1], [0, 0, 1, 1], [], []>} : vector<16x64xbf16>, vector<64x128xbf16>, vector<16x128xf32> -> vector<16x128xf32>
    %21 = arith.addf %14, %20 : vector<16x128xf32>
    %22 = vector.shape_cast %21 : vector<16x128xf32> to vector<1x16x128xf32>
    %c0_18 = arith.constant 0 : index
    %c0_19 = arith.constant 0 : index
    %c0_20 = arith.constant 0 : index
    %23 = vector.load %arg3[%c0_18, %c0_19, %c0_20] : memref<1x16x128xf32, #tpu.memory_space<vmem>>, vector<1x16x128xf32>
    tpu.vector_store %arg3[%c0_18, %c0_19, %c0_20], %22 {strides = array<i32>} : memref<1x16x128xf32, #tpu.memory_space<vmem>>, vector<1x16x128xf32>,
    %cst_21 = arith.constant dense<0.000000e+00> : vector<128xf32>
    %24 = vector.multi_reduction <add>, %21, %cst_21 [0] : vector<16x128xf32> to vector<128xf32>
    %25 = vector.shape_cast %24 : vector<128xf32> to vector<1x128xf32>
    %26 = vector.shape_cast %25 : vector<1x128xf32> to vector<1x1x128xf32>
    %c0_22 = arith.constant 0 : index
    %c0_23 = arith.constant 0 : index
    %c0_24 = arith.constant 0 : index
    %27 = vector.load %arg4[%c0_22, %c0_23, %c0_24] : memref<1x1x128xf32, #tpu.memory_space<vmem>>, vector<1x1x128xf32>
    tpu.vector_store %arg4[%c0_22, %c0_23, %c0_24], %26 {strides = array<i32>} : memref<1x1x128xf32, #tpu.memory_space<vmem>>, vector<1x1x128xf32>,
    %28 = arith.mulf %21, %21 : vector<16x128xf32>
    %cst_25 = arith.constant dense<0.000000e+00> : vector<128xf32>
    %29 = vector.multi_reduction <add>, %28, %cst_25 [0] : vector<16x128xf32> to vector<128xf32>
    %30 = vector.shape_cast %29 : vector<128xf32> to vector<1x128xf32>
    %31 = vector.shape_cast %30 : vector<1x128xf32> to vector<1x1x128xf32>
    %c0_26 = arith.constant 0 : index
    %c0_27 = arith.constant 0 : index
    %c0_28 = arith.constant 0 : index
    %32 = vector.load %arg5[%c0_26, %c0_27, %c0_28] : memref<1x1x128xf32, #tpu.memory_space<vmem>>, vector<1x1x128xf32>
    tpu.vector_store %arg5[%c0_26, %c0_27, %c0_28], %31 {strides = array<i32>} : memref<1x1x128xf32, #tpu.memory_space<vmem>>, vector<1x1x128xf32>,
    return
  }
  func.func @transform_0(%arg0: i32) -> (i32, i32, i32) {
    %c0_i32 = arith.constant 0 : i32
    %c0_i32_0 = arith.constant 0 : i32
    %c0_i32_1 = arith.constant 0 : i32
    return %arg0, %c0_i32, %c0_i32_0 : i32, i32, i32
  }
  func.func @transform_1(%arg0: i32) -> (i32, i32, i32) {
    %c0_i32 = arith.constant 0 : i32
    %c0_i32_0 = arith.constant 0 : i32
    %c0_i32_1 = arith.constant 0 : i32
    %c0_i32_2 = arith.constant 0 : i32
    return %c0_i32, %c0_i32_0, %c0_i32_1 : i32, i32, i32
  }
  func.func @transform_2(%arg0: i32) -> (i32, i32, i32) {
    %c0_i32 = arith.constant 0 : i32
    %c0_i32_0 = arith.constant 0 : i32
    %c0_i32_1 = arith.constant 0 : i32
    return %arg0, %c0_i32, %c0_i32_0 : i32, i32, i32
  }
  func.func @transform_3(%arg0: i32) -> (i32, i32, i32) {
    %c0_i32 = arith.constant 0 : i32
    %c0_i32_0 = arith.constant 0 : i32
    %c0_i32_1 = arith.constant 0 : i32
    return %arg0, %c0_i32, %c0_i32_0 : i32, i32, i32
  }
  func.func @transform_4(%arg0: i32) -> (i32, i32, i32) {
    %c0_i32 = arith.constant 0 : i32
    %c0_i32_0 = arith.constant 0 : i32
    %c0_i32_1 = arith.constant 0 : i32
    return %arg0, %c0_i32, %c0_i32_0 : i32, i32, i32
  }
}

module attributes {stable_mosaic.version = 11 : i64} {
  func.func @_conv2_kernel(%arg0: i32, %arg1: memref<1x16x128xf32, #tpu.memory_space<vmem>>, %arg2: memref<1x128xf32, #tpu.memory_space<vmem>>, %arg3: memref<1x128xf32, #tpu.memory_space<vmem>>, %arg4: memref<3x128x128xbf16, #tpu.memory_space<vmem>>, %arg5: memref<1x16x128xf32, #tpu.memory_space<vmem>>, %arg6: memref<1x1x128xf32, #tpu.memory_space<vmem>>, %arg7: memref<1x1x128xf32, #tpu.memory_space<vmem>>, %arg8: memref<1x18x128xf32, #tpu.memory_space<vmem>>) attributes {dimension_semantics = [#tpu.dimension_semantics<parallel>], iteration_bounds = array<i64: 2>, scalar_prefetch = 0 : i64, scratch_operands = 1 : i64, tpu.core_type = #tpu.core_type<tc>, window_params = [{transform_indices = @transform_0, window_bounds = array<i64: 1, 16, 128>}, {pipeline_mode = #tpu.pipeline_mode<synchronous>, transform_indices = @transform_1, window_bounds = array<i64: 1, 128>}, {pipeline_mode = #tpu.pipeline_mode<synchronous>, transform_indices = @transform_2, window_bounds = array<i64: 1, 128>}, {pipeline_mode = #tpu.pipeline_mode<synchronous>, transform_indices = @transform_3, window_bounds = array<i64: 3, 128, 128>}, {transform_indices = @transform_4, window_bounds = array<i64: 1, 16, 128>}, {transform_indices = @transform_5, window_bounds = array<i64: 1, 1, 128>}, {transform_indices = @transform_6, window_bounds = array<i64: 1, 1, 128>}]} {
    %c0 = arith.constant 0 : index
    %c0_0 = arith.constant 0 : index
    %c0_1 = arith.constant 0 : index
    %0 = vector.load %arg1[%c0, %c0_0, %c0_1] : memref<1x16x128xf32, #tpu.memory_space<vmem>>, vector<1x16x128xf32>
    %1 = vector.shape_cast %0 : vector<1x16x128xf32> to vector<16x128xf32>
    %c0_2 = arith.constant 0 : index
    %c0_3 = arith.constant 0 : index
    %2 = vector.load %arg2[%c0_2, %c0_3] : memref<1x128xf32, #tpu.memory_space<vmem>>, vector<1x128xf32>
    %3 = vector.broadcast %2 : vector<1x128xf32> to vector<16x128xf32>
    %4 = arith.mulf %1, %3 : vector<16x128xf32>
    %c0_4 = arith.constant 0 : index
    %c0_5 = arith.constant 0 : index
    %5 = vector.load %arg3[%c0_4, %c0_5] : memref<1x128xf32, #tpu.memory_space<vmem>>, vector<1x128xf32>
    %6 = vector.broadcast %5 : vector<1x128xf32> to vector<16x128xf32>
    %7 = arith.addf %4, %6 : vector<16x128xf32>
    %cst = arith.constant 0.000000e+00 : f32
    %8 = vector.broadcast %cst : f32 to vector<16x128xf32>
    %9 = arith.maximumf %7, %8 : vector<16x128xf32>
    %cst_6 = arith.constant 0.000000e+00 : f32
    %10 = vector.broadcast %cst_6 : f32 to vector<1x1x128xf32>
    %c0_7 = arith.constant 0 : index
    %c0_8 = arith.constant 0 : index
    %c0_9 = arith.constant 0 : index
    %11 = vector.load %arg8[%c0_7, %c0_8, %c0_9] : memref<1x18x128xf32, #tpu.memory_space<vmem>>, vector<1x1x128xf32>
    tpu.vector_store %arg8[%c0_7, %c0_8, %c0_9], %10 {strides = array<i32>} : memref<1x18x128xf32, #tpu.memory_space<vmem>>, vector<1x1x128xf32>,
    %cst_10 = arith.constant 0.000000e+00 : f32
    %12 = vector.broadcast %cst_10 : f32 to vector<1x1x128xf32>
    %c0_11 = arith.constant 0 : index
    %c17 = arith.constant 17 : index
    %c0_12 = arith.constant 0 : index
    %13 = vector.load %arg8[%c0_11, %c17, %c0_12] : memref<1x18x128xf32, #tpu.memory_space<vmem>>, vector<1x1x128xf32>
    tpu.vector_store %arg8[%c0_11, %c17, %c0_12], %12 {strides = array<i32>} : memref<1x18x128xf32, #tpu.memory_space<vmem>>, vector<1x1x128xf32>,
    %14 = vector.shape_cast %9 : vector<16x128xf32> to vector<1x16x128xf32>
    %c0_13 = arith.constant 0 : index
    %c1 = arith.constant 1 : index
    %c0_14 = arith.constant 0 : index
    %15 = vector.load %arg8[%c0_13, %c1, %c0_14] : memref<1x18x128xf32, #tpu.memory_space<vmem>>, vector<1x16x128xf32>
    tpu.vector_store %arg8[%c0_13, %c1, %c0_14], %14 {strides = array<i32>} : memref<1x18x128xf32, #tpu.memory_space<vmem>>, vector<1x16x128xf32>,
    %cst_15 = arith.constant 0.000000e+00 : f32
    %16 = vector.broadcast %cst_15 : f32 to vector<16x128xf32>
    %c0_16 = arith.constant 0 : index
    %c0_17 = arith.constant 0 : index
    %c0_18 = arith.constant 0 : index
    %17 = vector.load %arg8[%c0_16, %c0_17, %c0_18] : memref<1x18x128xf32, #tpu.memory_space<vmem>>, vector<1x16x128xf32>
    %18 = vector.shape_cast %17 : vector<1x16x128xf32> to vector<16x128xf32>
    %19 = arith.truncf %18 : vector<16x128xf32> to vector<16x128xbf16>
    %c0_19 = arith.constant 0 : index
    %c0_20 = arith.constant 0 : index
    %c0_21 = arith.constant 0 : index
    %20 = vector.load %arg4[%c0_19, %c0_20, %c0_21] : memref<3x128x128xbf16, #tpu.memory_space<vmem>>, vector<1x128x128xbf16>
    %21 = vector.shape_cast %20 : vector<1x128x128xbf16> to vector<128x128xbf16>
    %cst_22 = arith.constant dense<0.000000e+00> : vector<16x128xf32>
    %22 = tpu.matmul %19, %21, %cst_22 {dimension_numbers = #tpu.dot_dimension_numbers<[1], [0], [0], [1], [0, 0, 1, 1], [], []>} : vector<16x128xbf16>, vector<128x128xbf16>, vector<16x128xf32> -> vector<16x128xf32>
    %23 = arith.addf %16, %22 : vector<16x128xf32>
    %c0_23 = arith.constant 0 : index
    %c1_24 = arith.constant 1 : index
    %c0_25 = arith.constant 0 : index
    %24 = vector.load %arg8[%c0_23, %c1_24, %c0_25] : memref<1x18x128xf32, #tpu.memory_space<vmem>>, vector<1x16x128xf32>
    %25 = vector.shape_cast %24 : vector<1x16x128xf32> to vector<16x128xf32>
    %26 = arith.truncf %25 : vector<16x128xf32> to vector<16x128xbf16>
    %c1_26 = arith.constant 1 : index
    %c0_27 = arith.constant 0 : index
    %c0_28 = arith.constant 0 : index
    %27 = vector.load %arg4[%c1_26, %c0_27, %c0_28] : memref<3x128x128xbf16, #tpu.memory_space<vmem>>, vector<1x128x128xbf16>
    %28 = vector.shape_cast %27 : vector<1x128x128xbf16> to vector<128x128xbf16>
    %cst_29 = arith.constant dense<0.000000e+00> : vector<16x128xf32>
    %29 = tpu.matmul %26, %28, %cst_29 {dimension_numbers = #tpu.dot_dimension_numbers<[1], [0], [0], [1], [0, 0, 1, 1], [], []>} : vector<16x128xbf16>, vector<128x128xbf16>, vector<16x128xf32> -> vector<16x128xf32>
    %30 = arith.addf %23, %29 : vector<16x128xf32>
    %c0_30 = arith.constant 0 : index
    %c2 = arith.constant 2 : index
    %c0_31 = arith.constant 0 : index
    %31 = vector.load %arg8[%c0_30, %c2, %c0_31] : memref<1x18x128xf32, #tpu.memory_space<vmem>>, vector<1x16x128xf32>
    %32 = vector.shape_cast %31 : vector<1x16x128xf32> to vector<16x128xf32>
    %33 = arith.truncf %32 : vector<16x128xf32> to vector<16x128xbf16>
    %c2_32 = arith.constant 2 : index
    %c0_33 = arith.constant 0 : index
    %c0_34 = arith.constant 0 : index
    %34 = vector.load %arg4[%c2_32, %c0_33, %c0_34] : memref<3x128x128xbf16, #tpu.memory_space<vmem>>, vector<1x128x128xbf16>
    %35 = vector.shape_cast %34 : vector<1x128x128xbf16> to vector<128x128xbf16>
    %cst_35 = arith.constant dense<0.000000e+00> : vector<16x128xf32>
    %36 = tpu.matmul %33, %35, %cst_35 {dimension_numbers = #tpu.dot_dimension_numbers<[1], [0], [0], [1], [0, 0, 1, 1], [], []>} : vector<16x128xbf16>, vector<128x128xbf16>, vector<16x128xf32> -> vector<16x128xf32>
    %37 = arith.addf %30, %36 : vector<16x128xf32>
    %38 = vector.shape_cast %37 : vector<16x128xf32> to vector<1x16x128xf32>
    %c0_36 = arith.constant 0 : index
    %c0_37 = arith.constant 0 : index
    %c0_38 = arith.constant 0 : index
    %39 = vector.load %arg5[%c0_36, %c0_37, %c0_38] : memref<1x16x128xf32, #tpu.memory_space<vmem>>, vector<1x16x128xf32>
    tpu.vector_store %arg5[%c0_36, %c0_37, %c0_38], %38 {strides = array<i32>} : memref<1x16x128xf32, #tpu.memory_space<vmem>>, vector<1x16x128xf32>,
    %cst_39 = arith.constant dense<0.000000e+00> : vector<128xf32>
    %40 = vector.multi_reduction <add>, %37, %cst_39 [0] : vector<16x128xf32> to vector<128xf32>
    %41 = vector.shape_cast %40 : vector<128xf32> to vector<1x128xf32>
    %42 = vector.shape_cast %41 : vector<1x128xf32> to vector<1x1x128xf32>
    %c0_40 = arith.constant 0 : index
    %c0_41 = arith.constant 0 : index
    %c0_42 = arith.constant 0 : index
    %43 = vector.load %arg6[%c0_40, %c0_41, %c0_42] : memref<1x1x128xf32, #tpu.memory_space<vmem>>, vector<1x1x128xf32>
    tpu.vector_store %arg6[%c0_40, %c0_41, %c0_42], %42 {strides = array<i32>} : memref<1x1x128xf32, #tpu.memory_space<vmem>>, vector<1x1x128xf32>,
    %44 = arith.mulf %37, %37 : vector<16x128xf32>
    %cst_43 = arith.constant dense<0.000000e+00> : vector<128xf32>
    %45 = vector.multi_reduction <add>, %44, %cst_43 [0] : vector<16x128xf32> to vector<128xf32>
    %46 = vector.shape_cast %45 : vector<128xf32> to vector<1x128xf32>
    %47 = vector.shape_cast %46 : vector<1x128xf32> to vector<1x1x128xf32>
    %c0_44 = arith.constant 0 : index
    %c0_45 = arith.constant 0 : index
    %c0_46 = arith.constant 0 : index
    %48 = vector.load %arg7[%c0_44, %c0_45, %c0_46] : memref<1x1x128xf32, #tpu.memory_space<vmem>>, vector<1x1x128xf32>
    tpu.vector_store %arg7[%c0_44, %c0_45, %c0_46], %47 {strides = array<i32>} : memref<1x1x128xf32, #tpu.memory_space<vmem>>, vector<1x1x128xf32>,
    return
  }
  func.func @transform_0(%arg0: i32) -> (i32, i32, i32) {
    %c0_i32 = arith.constant 0 : i32
    %c0_i32_0 = arith.constant 0 : i32
    %c0_i32_1 = arith.constant 0 : i32
    return %arg0, %c0_i32, %c0_i32_0 : i32, i32, i32
  }
  func.func @transform_1(%arg0: i32) -> (i32, i32) {
    %c0_i32 = arith.constant 0 : i32
    %c0_i32_0 = arith.constant 0 : i32
    %c0_i32_1 = arith.constant 0 : i32
    return %c0_i32, %c0_i32_0 : i32, i32
  }
  func.func @transform_2(%arg0: i32) -> (i32, i32) {
    %c0_i32 = arith.constant 0 : i32
    %c0_i32_0 = arith.constant 0 : i32
    %c0_i32_1 = arith.constant 0 : i32
    return %c0_i32, %c0_i32_0 : i32, i32
  }
  func.func @transform_3(%arg0: i32) -> (i32, i32, i32) {
    %c0_i32 = arith.constant 0 : i32
    %c0_i32_0 = arith.constant 0 : i32
    %c0_i32_1 = arith.constant 0 : i32
    %c0_i32_2 = arith.constant 0 : i32
    return %c0_i32, %c0_i32_0, %c0_i32_1 : i32, i32, i32
  }
  func.func @transform_4(%arg0: i32) -> (i32, i32, i32) {
    %c0_i32 = arith.constant 0 : i32
    %c0_i32_0 = arith.constant 0 : i32
    %c0_i32_1 = arith.constant 0 : i32
    return %arg0, %c0_i32, %c0_i32_0 : i32, i32, i32
  }
  func.func @transform_5(%arg0: i32) -> (i32, i32, i32) {
    %c0_i32 = arith.constant 0 : i32
    %c0_i32_0 = arith.constant 0 : i32
    %c0_i32_1 = arith.constant 0 : i32
    return %arg0, %c0_i32, %c0_i32_0 : i32, i32, i32
  }
  func.func @transform_6(%arg0: i32) -> (i32, i32, i32) {
    %c0_i32 = arith.constant 0 : i32
    %c0_i32_0 = arith.constant 0 : i32
    %c0_i32_1 = arith.constant 0 : i32
    return %arg0, %c0_i32, %c0_i32_0 : i32, i32, i32
  }
}

module attributes {stable_mosaic.version = 11 : i64} {
  func.func @_residual_out_kernel(%arg0: i32, %arg1: memref<1x16x128xf32, #tpu.memory_space<vmem>>, %arg2: memref<1x18x64xf32, #tpu.memory_space<vmem>>, %arg3: memref<64x128xbf16, #tpu.memory_space<vmem>>, %arg4: memref<1x128xf32, #tpu.memory_space<vmem>>, %arg5: memref<1x128xf32, #tpu.memory_space<vmem>>, %arg6: memref<1x128xf32, #tpu.memory_space<vmem>>, %arg7: memref<1x16x128xf32, #tpu.memory_space<vmem>>) attributes {dimension_semantics = [#tpu.dimension_semantics<parallel>], iteration_bounds = array<i64: 2>, scalar_prefetch = 0 : i64, scratch_operands = 0 : i64, tpu.core_type = #tpu.core_type<tc>, window_params = [{transform_indices = @transform_0, window_bounds = array<i64: 1, 16, 128>}, {transform_indices = @transform_1, window_bounds = array<i64: 1, 18, 64>}, {pipeline_mode = #tpu.pipeline_mode<synchronous>, transform_indices = @transform_2, window_bounds = array<i64: 64, 128>}, {pipeline_mode = #tpu.pipeline_mode<synchronous>, transform_indices = @transform_3, window_bounds = array<i64: 1, 128>}, {pipeline_mode = #tpu.pipeline_mode<synchronous>, transform_indices = @transform_4, window_bounds = array<i64: 1, 128>}, {pipeline_mode = #tpu.pipeline_mode<synchronous>, transform_indices = @transform_5, window_bounds = array<i64: 1, 128>}, {transform_indices = @transform_6, window_bounds = array<i64: 1, 16, 128>}]} {
    %c0 = arith.constant 0 : index
    %c1 = arith.constant 1 : index
    %c0_0 = arith.constant 0 : index
    %0 = vector.load %arg2[%c0, %c1, %c0_0] : memref<1x18x64xf32, #tpu.memory_space<vmem>>, vector<1x16x64xf32>
    %1 = vector.shape_cast %0 : vector<1x16x64xf32> to vector<16x64xf32>
    %2 = arith.truncf %1 : vector<16x64xf32> to vector<16x64xbf16>
    %c0_1 = arith.constant 0 : index
    %c0_2 = arith.constant 0 : index
    %3 = vector.load %arg3[%c0_1, %c0_2] : memref<64x128xbf16, #tpu.memory_space<vmem>>, vector<64x128xbf16>
    %cst = arith.constant dense<0.000000e+00> : vector<16x128xf32>
    %4 = tpu.matmul %2, %3, %cst {dimension_numbers = #tpu.dot_dimension_numbers<[1], [0], [0], [1], [0, 0, 1, 1], [], []>} : vector<16x64xbf16>, vector<64x128xbf16>, vector<16x128xf32> -> vector<16x128xf32>
    %c0_3 = arith.constant 0 : index
    %c0_4 = arith.constant 0 : index
    %5 = vector.load %arg4[%c0_3, %c0_4] : memref<1x128xf32, #tpu.memory_space<vmem>>, vector<1x128xf32>
    %6 = vector.broadcast %5 : vector<1x128xf32> to vector<16x128xf32>
    %7 = arith.addf %4, %6 : vector<16x128xf32>
    %c0_5 = arith.constant 0 : index
    %c0_6 = arith.constant 0 : index
    %c0_7 = arith.constant 0 : index
    %8 = vector.load %arg1[%c0_5, %c0_6, %c0_7] : memref<1x16x128xf32, #tpu.memory_space<vmem>>, vector<1x16x128xf32>
    %9 = vector.shape_cast %8 : vector<1x16x128xf32> to vector<16x128xf32>
    %c0_8 = arith.constant 0 : index
    %c0_9 = arith.constant 0 : index
    %10 = vector.load %arg5[%c0_8, %c0_9] : memref<1x128xf32, #tpu.memory_space<vmem>>, vector<1x128xf32>
    %11 = vector.broadcast %10 : vector<1x128xf32> to vector<16x128xf32>
    %12 = arith.mulf %9, %11 : vector<16x128xf32>
    %c0_10 = arith.constant 0 : index
    %c0_11 = arith.constant 0 : index
    %13 = vector.load %arg6[%c0_10, %c0_11] : memref<1x128xf32, #tpu.memory_space<vmem>>, vector<1x128xf32>
    %14 = vector.broadcast %13 : vector<1x128xf32> to vector<16x128xf32>
    %15 = arith.addf %12, %14 : vector<16x128xf32>
    %16 = arith.addf %7, %15 : vector<16x128xf32>
    %cst_12 = arith.constant 0.000000e+00 : f32
    %17 = vector.broadcast %cst_12 : f32 to vector<16x128xf32>
    %18 = arith.maximumf %16, %17 : vector<16x128xf32>
    %19 = vector.shape_cast %18 : vector<16x128xf32> to vector<1x16x128xf32>
    %c0_13 = arith.constant 0 : index
    %c0_14 = arith.constant 0 : index
    %c0_15 = arith.constant 0 : index
    %20 = vector.load %arg7[%c0_13, %c0_14, %c0_15] : memref<1x16x128xf32, #tpu.memory_space<vmem>>, vector<1x16x128xf32>
    tpu.vector_store %arg7[%c0_13, %c0_14, %c0_15], %19 {strides = array<i32>} : memref<1x16x128xf32, #tpu.memory_space<vmem>>, vector<1x16x128xf32>,
    return
  }
  func.func @transform_0(%arg0: i32) -> (i32, i32, i32) {
    %c0_i32 = arith.constant 0 : i32
    %c0_i32_0 = arith.constant 0 : i32
    %c0_i32_1 = arith.constant 0 : i32
    return %arg0, %c0_i32, %c0_i32_0 : i32, i32, i32
  }
  func.func @transform_1(%arg0: i32) -> (i32, i32, i32) {
    %c0_i32 = arith.constant 0 : i32
    %c0_i32_0 = arith.constant 0 : i32
    %c0_i32_1 = arith.constant 0 : i32
    return %arg0, %c0_i32, %c0_i32_0 : i32, i32, i32
  }
  func.func @transform_2(%arg0: i32) -> (i32, i32) {
    %c0_i32 = arith.constant 0 : i32
    %c0_i32_0 = arith.constant 0 : i32
    %c0_i32_1 = arith.constant 0 : i32
    return %c0_i32, %c0_i32_0 : i32, i32
  }
  func.func @transform_3(%arg0: i32) -> (i32, i32) {
    %c0_i32 = arith.constant 0 : i32
    %c0_i32_0 = arith.constant 0 : i32
    %c0_i32_1 = arith.constant 0 : i32
    return %c0_i32, %c0_i32_0 : i32, i32
  }
  func.func @transform_4(%arg0: i32) -> (i32, i32) {
    %c0_i32 = arith.constant 0 : i32
    %c0_i32_0 = arith.constant 0 : i32
    %c0_i32_1 = arith.constant 0 : i32
    return %c0_i32, %c0_i32_0 : i32, i32
  }
  func.func @transform_5(%arg0: i32) -> (i32, i32) {
    %c0_i32 = arith.constant 0 : i32
    %c0_i32_0 = arith.constant 0 : i32
    %c0_i32_1 = arith.constant 0 : i32
    return %c0_i32, %c0_i32_0 : i32, i32
  }
  func.func @transform_6(%arg0: i32) -> (i32, i32, i32) {
    %c0_i32 = arith.constant 0 : i32
    %c0_i32_0 = arith.constant 0 : i32
    %c0_i32_1 = arith.constant 0 : i32
    return %arg0, %c0_i32, %c0_i32_0 : i32, i32, i32
  }
}

</mosaic_0001>

<bundles_post_ra>
// kernel: tile.33
= control target key start
LH: loop header
LB: loop body
LE: loop exit
PB: predicated region body
PF: predicated region fallthrough
CT: control target
= control target key end

     0   :  { %s28_s0 = inlined_call_operand.vmem [shape: f32[8], index: 0, kind: input, shape index: {}]   ;;  %s29_s1 = inlined_call_operand.vmem [shape: f32[16,8], index: 1, kind: output, shape index: {}]  }
   0x1   :  { %v4_v0 = vld [vmem:[%s28_s0] ss:$0 sm:$0xff] }
   0x2   :  { %5 = vst [vmem:[%s29_s1] sm:$0xff] %v4_v0  ;;  %8 = vst [vmem:[%s29_s1 + $0x8] sm:$0xff] %v4_v0 }

// kernel: tile.34
= control target key start
LH: loop header
LB: loop body
LE: loop exit
PB: predicated region body
PF: predicated region fallthrough
CT: control target
= control target key end

     0   :  { %s167_s10 = smov 120   ;;  %s168_s11 = smov 104   ;;  %vm4_vm0 = vcmask 64512   ;;  %s253_s0 = inlined_call_operand.vmem [shape: f32[16,8], index: 0, kind: input, shape index: {}]   ;;  %s254_s1 = inlined_call_operand.hbm [shape: f32[1,128], index: 1, kind: output, shape index: {}]  }
   0x1   :  { %v112_v0 = vld [vmem:[%s253_s0 + $0xf] sm:$0x1]   ;;  %v114_v1 = vld [vmem:[%s253_s0 + $0xd] sm:$0x1]   ;;  %v113_v2 = vld [vmem:[%s253_s0 + $0xe] sm:$0x1]  }
   0x2   :  { %8 = vrot.lane.b32.xlu0 %v112_v0, %s167_s10  ;;  %20 = vrot.lane.b32.xlu1 %v114_v1, %s168_s11  ;;  %v115_v3 = vld [vmem:[%s253_s0 + $0xc] sm:$0x1]   ;;  %s169_s16 = smov 112   ;;  %s170_s17 = smov 96   ;;  %v116_v4 = vld [vmem:[%s253_s0 + $0xb] sm:$0x1]  }
   0x3   :  { %v117_v5 = vld [vmem:[%s253_s0 + $0xa] sm:$0x1]   ;;  %v3_v6 = vld [vmem:[%s253_s0] sm:$0x1]  }
   0x6   :  { %14 = vrot.lane.b32.xlu0 %v113_v2, %s169_s16  ;;  %26 = vrot.lane.b32.xlu1 %v115_v3, %s170_s17 }
   0x7   :  { %2 = vsyncpa [#allocation1], 0  ;;  %s171_s24 = smov 88   ;;  %s172_s25 = smov 80   ;;  %5 = vst.msk [vmem:[#allocation2] sm:$0x1] %vm4_vm0, %v3_v6  }
   0x8   :  { %v118_v7 = vld [vmem:[%s253_s0 + $0x9] sm:$0x1]   ;;  %v119_v8 = vld [vmem:[%s253_s0 + $0x8] sm:$0x1]   ;;  %s173_s30 = smov 72   ;;  %s174_s2 = smov 64  }
   0x9   :  { %v120_v9 = vld [vmem:[%s253_s0 + $0x7] sm:$0x1]   ;;  %v121_v10 = vld [vmem:[%s253_s0 + $0x6] sm:$0x1]   ;;  %s175_s7 = smov 56   ;;  %s176_s8 = smov 48  }
   0xa   :  { %32 = vrot.lane.b32.xlu0 %v116_v4, %s171_s24  ;;  %38 = vrot.lane.b32.xlu1 %v117_v5, %s172_s25  ;;  %v122_v11 = vld [vmem:[%s253_s0 + $0x5] sm:$0x1]   ;;  %v123_v12 = vld [vmem:[%s253_s0 + $0x4] sm:$0x1]   ;;  %s177_s13 = smov 40   ;;  %s178_s14 = smov 32  }
   0xb   :  { %v124_v13 = vld [vmem:[%s253_s0 + $0x3] sm:$0x1]   ;;  %v125_v14 = vld [vmem:[%s253_s0 + $0x2] sm:$0x1]   ;;  %s179_s19 = smov 24   ;;  %s180_s20 = smov 16  }
   0xc   :  { %v126_v15 = vld [vmem:[%s253_s0 + $0x1] sm:$0x1]   ;;  %s181_s0 = smov 8   ;;  %vm10_vm1 = vcmask 1048512   ;;  %vm16_vm2 = vcmask 982912   ;;  %vm22_vm3 = vcmask 917312  }
   0xd   :  { %vm28_vm4 = vcmask 851712   ;;  %vm34_vm5 = vcmask 786112   ;;  %vm40_vm6 = vcmask 720512   ;;  %vm46_vm7 = vcmask 654912   ;;  %s182_s23 = smov [#allocation0]  }
   0xe   :  { %44 = vrot.lane.b32.xlu0 %v118_v7, %s173_s30  ;;  %50 = vrot.lane.b32.xlu1 %v119_v8, %s174_s2  ;;  %vm52_vm8 = vcmask 589312   ;;  %vm58_vm9 = vcmask 523712   ;;  %vm64_vm10 = vcmask 458112   ;;  %vm70_vm11 = vcmask 392512   ;;  %s106_s24 = sshll.u32 %s182_s23, 4  ;;  %s107_s24 = int_to_ptr.vmem [resolvable:$true] %s106_s24 }
   0xf   :  { %vm76_vm12 = vcmask 326912   ;;  %vm82_vm13 = vcmask 261312   ;;  %vm88_vm14 = vcmask 195712   ;;  %vm94_vm15 = vcmask 130112   ;;  %s143_s25 = scalar_lea.vmem %s107_s24, 16  ;;  %s147_s26 = scalar_lea.vmem %s107_s24, 32 }
  0x10   :  { %p144_p0 = scmp.ne.s32.totalorder %s107_s24, %s143_s25  ;;  %p148_p1 = scmp.lt.s32.totalorder %s107_s24, %s107_s24 }
  0x11   :  { %p149_p2 = scmp.lt.s32.totalorder %s147_s26, %s143_s25 }
  0x12   :  { %56 = vrot.lane.b32.xlu0 %v120_v9, %s175_s7  ;;  %62 = vrot.lane.b32.xlu1 %v121_v10, %s176_s8 }
  0x13   :  { %p150_p3 = por %p149_p2, %p148_p1 }
  0x15   :  { %p151_p4 = pnand %p150_p3, %p144_p0 }
  0x16   :  { %68 = vrot.lane.b32.xlu0 %v122_v11, %s177_s13  ;;  %74 = vrot.lane.b32.xlu1 %v123_v12, %s178_s14 }
  0x1a   :  { %80 = vrot.lane.b32.xlu0 %v124_v13, %s179_s19  ;;  %86 = vrot.lane.b32.xlu1 %v125_v14, %s180_s20 }
  0x1e   :  { %92 = vrot.lane.b32.xlu0 %v126_v15, %s181_s0 }
  0x74   :  { %v9_v16 = vpop.permute.xlu0 %8   ;;  %v21_v17 = vpop.permute.xlu1 %20  }
  0x75   :  { %11 = vst.msk [vmem:[#allocation2] sm:$0x1] %vm10_vm1, %v9_v16  }
  0x78   :  { %v15_v18 = vpop.permute.xlu0 %14   ;;  %v27_v19 = vpop.permute.xlu1 %26  }
  0x79   :  { %17 = vst.msk [vmem:[#allocation2] sm:$0x1] %vm16_vm2, %v15_v18  }
  0x7a   :  { %23 = vst.msk [vmem:[#allocation2] sm:$0x1] %vm22_vm3, %v21_v17  }
  0x7b   :  { %29 = vst.msk [vmem:[#allocation2] sm:$0x1] %vm28_vm4, %v27_v19  }
  0x7c   :  { %v33_v20 = vpop.permute.xlu0 %32   ;;  %v39_v21 = vpop.permute.xlu1 %38  }
  0x7d   :  { %35 = vst.msk [vmem:[#allocation2] sm:$0x1] %vm34_vm5, %v33_v20  }
  0x7e   :  { %41 = vst.msk [vmem:[#allocation2] sm:$0x1] %vm40_vm6, %v39_v21  }
  0x80   :  { %v45_v22 = vpop.permute.xlu0 %44   ;;  %v51_v23 = vpop.permute.xlu1 %50  }
  0x81   :  { %47 = vst.msk [vmem:[#allocation2] sm:$0x1] %vm46_vm7, %v45_v22  }
  0x82   :  { %53 = vst.msk [vmem:[#allocation2] sm:$0x1] %vm52_vm8, %v51_v23  }
  0x84   :  { %v57_v24 = vpop.permute.xlu0 %56   ;;  %v63_v25 = vpop.permute.xlu1 %62  }
  0x85   :  { %59 = vst.msk [vmem:[#allocation2] sm:$0x1] %vm58_vm9, %v57_v24  }
  0x86   :  { %65 = vst.msk [vmem:[#allocation2] sm:$0x1] %vm64_vm10, %v63_v25  }
  0x88   :  { %v69_v26 = vpop.permute.xlu0 %68   ;;  %v75_v27 = vpop.permute.xlu1 %74  }
  0x89   :  { %71 = vst.msk [vmem:[#allocation2] sm:$0x1] %vm70_vm11, %v69_v26  }
  0x8a   :  { %77 = vst.msk [vmem:[#allocation2] sm:$0x1] %vm76_vm12, %v75_v27  }
  0x8c   :  { %v81_v28 = vpop.permute.xlu0 %80   ;;  %v87_v29 = vpop.permute.xlu1 %86  }
  0x8d   :  { %83 = vst.msk [vmem:[#allocation2] sm:$0x1] %vm82_vm13, %v81_v28  }
  0x8e   :  { %89 = vst.msk [vmem:[#allocation2] sm:$0x1] %vm88_vm14, %v87_v29  }
  0x90   :  { %v93_v30 = vpop.permute.xlu0 %92  }
  0x91   :  { %95 = vst.msk [vmem:[#allocation2] sm:$0x1] %vm94_vm15, %v93_v30  }
  0x98   :  { %v99_v31 = vld [vmem:[#allocation2] sm:$0x1] }
  0x99   :  { %101 = vst [vmem:[#allocation0] sm:$0x1] %v99_v31 }
  0x9a   :  { %154 = shalt.err (!%p151_p4)
}
  0x9b   :  { %s155_s29 = scalar_lea.hbm %s254_s1, 16 }
  0x9c   :  { %p156_p5 = scmp.ne.s32.totalorder %s254_s1, %s155_s29  ;;  %p159_p6 = scmp.lt.u32.totalorder %s155_s29, %s254_s1 }
  0x9e   :  { %p161_p7 = pnand %p159_p6, %p156_p5 }
  0xa0   :  { %164 = shalt.err (!%p161_p7)
}
  0xa1   :  { %109 = dma.vmem_to_hbm [thread:$0]  %s107_s24, 16, %s254_s1, [#allocation1]  }
  0xa2   :  { %165 = dma.done.wait [#allocation1], 16  }
  0xa3   :  { %166 = vsyncadd [#allocation1], 4294967280 }
  0xa4   :  { %111 = vsyncpa [#allocation1], 1 }

// kernel: resnet_block.3
= control target key start
LH: loop header
LB: loop body
LE: loop exit
PB: predicated region body
PF: predicated region fallthrough
CT: control target
= control target key end

     0   :  { %10 = vsyncpa [#allocation3], 0  ;;  %s1388_s0 = inlined_call_operand.hbm [shape: f32[2,18,64], index: 0, kind: input, shape index: {}]   ;;  %s1389_s1 = inlined_call_operand.hbm [shape: bf16[3,64,128], index: 1, kind: input, shape index: {}]   ;;  %s1390_s2 = inlined_call_operand.hbm [shape: f32[2,16,128], index: 2, kind: output, shape index: {0}]   ;;  %s1391_s3 = inlined_call_operand.hbm [shape: f32[2,1,128], index: 3, kind: output, shape index: {1}]   ;;  %s1392_s4 = inlined_call_operand.hbm [shape: f32[2,1,128], index: 4, kind: output, shape index: {2}]  }
   0x1   :  { %12 = vsyncpa [#allocation3 + $0x1], 0 }
   0x2   :  { %13 = vsyncpa [#allocation6], 0 }
   0x3   :  { %14 = vsyncpa [#allocation4], 0 }
   0x4   :  { %16 = vsyncpa [#allocation4 + $0x1], 0 }
   0x5   :  { %17 = vsyncpa [#allocation9], 0 }
   0x6   :  { %19 = vsyncpa [#allocation9 + $0x1], 0  ;;  %s1100_s15 = smov 0   ;;  %s1102_s16 = smov 0  }
   0x7   :  { %s1104_s17 = smov 0   ;;  %s1106_s18 = smov 0  }
   0x8 LB: > { %s1121_s19 = sadd.s32 4294967295, %s1060_s18   ;;  %s694_s20 = sadd.s32 4294967294, %s1060_s18   ;;  %s1060_s18 = sphi %s1106_s18, %s1412_s18   ;;  %s1056_s17 = sphi %s1104_s17, %s1411_s17   ;;  %s1052_s16 = sphi %s1102_s16, %s1410_s16   ;;  %s1048_s15 = sphi %s1100_s15, %s1409_s15  }
   0x9   : > { %p45_p0 = scmp.ne.s32.totalorder %s1052_s16, %s1048_s15  ;;  %p1393_p1 = scmp.eq.s32.totalorder %s1121_s19, 0 }
   0xa   : > { %p96_p3 = scmp.eq.s32.totalorder %s694_s20, 1  ;;  %p695_p5 = scmp.ge.s32.totalorder %s1060_s18, 1 }
   0xb   : > { %p1132_p4 = por %p1393_p1, %p45_p0  ;;  %p155_p7 = scmp.lt.s32.totalorder %s1060_s18, 3 }
   0xc   : > { %p1137_p6 = por %p96_p3, %p45_p0  ;;  %s1062_s24 = smov [#allocation5]  }
   0xd   : > { %s1396_s21 = scalar_select %p1132_p4, 1, 0 }
   0xe   : > { %s1397_s22 = scalar_select %p1137_p6, 1, 0 }
   0xf   : > { %p1142_p8 = pnand %p695_p5, %p155_p7  ;;  %s167_s25 = sshll.u32 %s1062_s24, 4  ;;  %s1146_s25 = int_to_ptr.vmem [resolvable:$true] %s167_s25 }
  0x10   : > { %s1158_s27 = sadd.s32 1, %s1060_s18   ;;  %s32_s28 = sadd.s32 1, %s1056_s17 }
  0x11   : > { %s1398_s23 = scalar_select %p1142_p8, 1, 0 }
  0x12   : > { %p797_p9 = pneg %p1142_p8  ;;  %s29_s29 = ssub.s32 %s1060_s18, %s1158_s27 }
  0x13   : > { %s872_s6 = scalar_lea.hbm %s1389_s1, 1536 }
  0x14   : > { %p1153_p11 = pnand %p797_p9, %p1393_p1  ;;  %p873_p12 = scmp.ne.s32.totalorder %s1389_s1, %s872_s6 }
  0x15   : > { %p879_p5 = scmp.lt.u32.totalorder %s872_s6, %s1389_s1 }
  0x16   : > { %p874_p13 = pneg %p1153_p11 }
  0x18   : > { %p875_p0 = pnand %p874_p13, %p873_p12 }
  0x1a   : > { %p876_p3 = pneg %p875_p0 }
  0x1c   : > { %p881_p7 = pnand %p879_p5, %p876_p3 }
  0x1e   : > { %884 = shalt.err (!%p881_p7)
}
  0x1f   : > { %s885_s11 = scalar_lea.vmem %s1146_s25, 1536  ;;  %p893_p2 = scmp.lt.s32.totalorder %s1146_s25, %s1146_s25 }
  0x20   : > { %p886_p9 = scmp.ne.s32.totalorder %s1146_s25, %s885_s11  ;;  %p894_p6 = scmp.lt.s32.totalorder %s885_s11, %s885_s11 }
  0x22   : > { %p888_p10 = pnand %p886_p9, %p874_p13  ;;  %p895_p4 = por %p894_p6, %p893_p2 }
  0x24   : > { %p889_p1 = pneg %p888_p10 }
  0x26   : > { %p896_p8 = pnand %p895_p4, %p889_p1 }
  0x28   : > { %899 = shalt.err (!%p896_p8)
}
  0x29   : > { %s1063_s12 = smov 64   ;;  %s1064_s13 = smov 4  }
  0x2a   : > { %800 = dma.hbm_to_vmem [thread:$0]  (!%p1153_p11), %s1389_s1, 1536, %s1146_s25, [#allocation6], %s1063_s12, %s1063_s12, %s1064_s13  }
  0x2b   : > { %p30_p2 = scmp.eq.s32.totalorder %s29_s29, 0  ;;  %p39_p1 = scmp.ne.s32.totalorder %s1056_s17, %s1052_s16 }
  0x2c   : > { %p40_p4 = scmp.eq.s32.totalorder %s1060_s18, 0  ;;  %p816_p6 = scmp.lt.s32.totalorder %s1060_s18, 2 }
  0x2d   : > { %s1189_s30 = scalar_select %p30_p2, %s1056_s17, %s32_s28  }
  0x2e   : > { %p41_p8 = por %p40_p4, %p39_p1  ;;  %p1400_p10 = scmp.eq.s32.totalorder %s1121_s19, 1 }
  0x2f   : > { %s181_s6 = sand.u32 1, %s1056_s17   ;;  %s783_s7 = smul.u32 384, %s1060_s18 }
  0x30   : > { %p1193_p12 = por %p1400_p10, %p39_p1  ;;  %s782_s8 = smul.u32 24, %s181_s6 }
  0x31   : > { %s1202_s10 = scalar_lea.hbm %s1388_s0, %s783_s7  ;;  %p1204_p11 = pnand %p816_p6, %p41_p8 }
  0x32   : > { %s185_s28 = scalar_lea.vmem [#allocation2], %s782_s8  ;;  %s1210_s11 = scalar_lea.sflag [#allocation3], %s181_s6 }
  0x33   : > { %s192_s29 = sshll.u32 %s185_s28, 4  ;;  %s900_s12 = scalar_lea.hbm %s1202_s10, 384  ;;  %s1208_s29 = int_to_ptr.vmem [resolvable:$true] %s192_s29 }
  0x34   : > { %p901_p13 = scmp.ne.s32.totalorder %s1202_s10, %s900_s12  ;;  %p902_p0 = pneg %p1204_p11 }
  0x35   : > { %s905_s24 = scalar_lea.hbm %s1388_s0, 768  ;;  %p906_p7 = scmp.lt.u32.totalorder %s1202_s10, %s1388_s0 }
  0x36   : > { %p903_p3 = pnand %p902_p0, %p901_p13  ;;  %p907_p9 = scmp.lt.u32.totalorder %s905_s24, %s900_s12 }
  0x37   : > { %p909_p1 = scmp.lt.u32.totalorder %s900_s12, %s1202_s10 }
  0x38   : > { %p904_p5 = pneg %p903_p3  ;;  %p908_p2 = por %p907_p9, %p906_p7 }
  0x3a   : > { %p910_p4 = por %p909_p1, %p908_p2 }
  0x3c   : > { %p911_p6 = pnand %p910_p4, %p904_p5 }
  0x3e   : > { %914 = shalt.err (!%p911_p6)
}
  0x3f   : > { %s915_s6 = scalar_lea.vmem %s1208_s29, 384  ;;  %s1065_s8 = smov [#allocation2]  }
  0x40   : > { %p916_p8 = scmp.ne.s32.totalorder %s1208_s29, %s915_s6  ;;  %s920_s9 = sshll.u32 %s1065_s8, 4  ;;  %s921_s9 = int_to_ptr.vmem [resolvable:$false] %s920_s9 }
  0x41   : > { %s922_s28 = scalar_lea.vmem %s921_s9, 768  ;;  %p923_p3 = scmp.lt.s32.totalorder %s1208_s29, %s921_s9 }
  0x42   : > { %p918_p10 = pnand %p916_p8, %p902_p0  ;;  %p924_p7 = scmp.lt.s32.totalorder %s922_s28, %s915_s6 }
  0x44   : > { %p919_p13 = pneg %p918_p10  ;;  %p925_p9 = por %p924_p7, %p923_p3 }
  0x46   : > { %p926_p2 = pnand %p925_p9, %p919_p13 }
  0x48   : > { %929 = shalt.err (!%p926_p2)
}
  0x49   : > { %s1066_s12 = smov 128   ;;  %s1067_s13 = smov 8  }
  0x4a   : > { %804 = dma.hbm_to_vmem [thread:$0]  (!%p1204_p11), %s1202_s10, 384, %s1208_s29, %s1210_s11, %s1066_s12, %s1066_s12, %s1067_s13  }
  0x4b   : > { %p1403_p0 = scmp.ne.s32.totalorder %s1398_s23, 0 }
  0x4c   : > { %s1241_s14 = sand.u32 (!%p1403_p0), 1, %s1052_s16   ;;  %p1404_p5 = scmp.ne.s32.totalorder (!%p1403_p0), %s1396_s21, 0 }
  0x4d   : > { %204 = sbr.rel (%p1403_p0) target bundleno = 402 (0x192), region = 28  ;;  %s207_s7 = scalar_lea.sflag (!%p1403_p0), [#allocation3], %s1241_s14 }
  0x4e   : > { %s784_s24 = smul.u32 (!%p1403_p0), 24, %s1241_s14 }
  0x50   : > { %s1245_s26 = scalar_lea.vmem (!%p1403_p0), [#allocation2], %s784_s24 }
  0x54   : > { %1031 = dma.done.wait (%p1404_p5), %s207_s7, 384  }
  0x55   : > { %1033 = vsyncadd (%p1404_p5), %s207_s7, 4294966912  ;;  %p1405_p11 = scmp.eq.s32.totalorder %s1121_s19, 0 }
  0x57   : > { %1035 = dma.done.wait (%p1405_p11), [#allocation6], 1536   ;;  %p1406_p1 = pmov %p1405_p11 }
  0x58   : > { %v1068_v0 = vmov 0.0   ;;  %vm1069_vm0 = vmmov 0   ;;  %v860_v1 = vld [vmem:[#allocation5] sm:$0xff]   ;;  %v861_v2 = vld [vmem:[#allocation5 + $0x8] sm:$0xff]   ;;  %v862_v4 = vld [vmem:[#allocation5 + $0x10] sm:$0xff]   ;;  %vm295_vm1 = vcmask 523264  }
  0x59   : > { %1037 = vsyncadd (%p1406_p1), [#allocation6], 4294965760  ;;  %752 = vmatprep.subr.bf16.mxu0 %v1068_v0  ;;  %740 = vmatprep.subr.bf16.mxu1 %v1068_v0  ;;  %v864_v3 = vld [vmem:[#allocation5 + $0x20] sm:$0xff]   ;;  %v866_v5 = vld [vmem:[#allocation5 + $0x28] sm:$0xff]   ;;  %s701_s21 = sshll.u32 %s1241_s14, 4  ;;  %s724_s25 = sshll.u32 %s1121_s19, 8 }
  0x5a   : > { %760 = vmatprep.mubr.msk.bf16.mxu0 %vm1069_vm0, %v1068_v0  ;;  %748 = vmatprep.mubr.msk.bf16.mxu1 %vm1069_vm0, %v1068_v0  ;;  %v863_v6 = vld [vmem:[#allocation5 + $0x18] sm:$0xff]   ;;  %v248_v7 = vld [vmem:[%s1245_s26] sm:$0xff]  ;;  %v865_v11 = vld [vmem:[#allocation5 + $0x40] sm:$0xff]   ;;  %s234_s23 = scalar_lea.vmem [#allocation7], %s701_s21  ;;  %s1274_s6 = scalar_lea.hbm %s1390_s2, %s724_s25 }
  0x5b   : > { %753 = vmatpush3.bf16.msra.mxu0 %v860_v1  ;;  %741 = vmatpush3.bf16.msra.mxu1 %v864_v3  ;;  %v249_v8 = vld [vmem:[%s1245_s26 + $0x8] sm:$0xff]  ;;  %v867_v16 = vld [vmem:[#allocation5 + $0x48] sm:$0xff]   ;;  %s532_s10 = sshll.u32 %s234_s23, 4  ;;  %s511_s8 = scalar_lea.sflag [#allocation4], %s1241_s14  ;;  %s1269_s10 = int_to_ptr.vmem [resolvable:$true] %s532_s10 }
  0x5c   : > { %754 = vmatprep.subr.bf16.mxu0 %v1068_v0  ;;  %742 = vmatprep.subr.bf16.mxu1 %v1068_v0  ;;  %v868_v9 = vld [vmem:[#allocation5 + $0x30] sm:$0xff]   ;;  %v250_v10 = vpack.c.bf16 %v249_v8, %v248_v7  ;;  %v870_v12 = vld [vmem:[#allocation5 + $0x38] sm:$0xff]   ;;  %s930_s9 = scalar_lea.vmem %s1269_s10, 256  ;;  %s1070_s28 = smov [#allocation7]  }
  0x5d   : > { %v259_v13 = vld [vmem:[%s1245_s26 + $0x1] sm:$0xff]  ;;  %v260_v14 = vld [vmem:[%s1245_s26 + $0x9] sm:$0xff]  ;;  %p931_p4 = scmp.ne.s32.totalorder %s1269_s10, %s930_s9  ;;  %s934_s12 = sshll.u32 %s1070_s28, 4  ;;  %s935_s12 = int_to_ptr.vmem [resolvable:$false] %s934_s12 }
  0x5e   : > { %v261_v15 = vpack.c.bf16 %v260_v14, %v259_v13  ;;  %v869_v17 = vld [vmem:[#allocation5 + $0x50] sm:$0xff]   ;;  %v871_v18 = vld [vmem:[#allocation5 + $0x58] sm:$0xff]   ;;  %s936_s13 = scalar_lea.vmem %s935_s12, 512  ;;  %p937_p10 = scmp.lt.s32.totalorder %s1269_s10, %s935_s12 }
  0x5f   : > { %755 = vmatpush3.bf16.msra.mxu0 %v861_v2  ;;  %743 = vmatpush3.bf16.msra.mxu1 %v866_v5  ;;  %v408_v19 = vld [vmem:[%s1245_s26 + $0x2] sm:$0xff]  ;;  %v409_v20 = vld [vmem:[%s1245_s26 + $0xa] sm:$0xff]  ;;  %p932_p6 = pnand %p931_p4, %p1193_p12  ;;  %p938_p13 = scmp.lt.s32.totalorder %s936_s13, %s930_s9 }
  0x60   : > { %756 = vmatprep.subr.bf16.mxu0 %v1068_v0  ;;  %744 = vmatprep.subr.bf16.mxu1 %v1068_v0  ;;  %v410_v21 = vpack.c.bf16 %v409_v20, %v408_v19 }
  0x61   : > { %p933_p8 = pneg %p932_p6  ;;  %p939_p3 = por %p938_p13, %p937_p10 }
  0x63   : > { %757 = vmatpush3.bf16.msra.mxu0 %v862_v4  ;;  %745 = vmatpush3.bf16.msra.mxu1 %v868_v9  ;;  %p940_p7 = pnand %p939_p3, %p933_p8 }
  0x64   : > { %758 = vmatprep.subr.bf16.mxu0 %v1068_v0  ;;  %746 = vmatprep.subr.bf16.mxu1 %v1068_v0 }
  0x67   : > { %759 = vmatpush3.bf16.msra.mxu0 %v863_v6  ;;  %747 = vmatpush3.bf16.msra.mxu1 %v870_v12 }
  0x68   : > { %764 = vmatprep.subr.bf16.mxu0 %v1068_v0 }
  0x6a   : > { %761 = vmatmul.mubr.msk.bf16.vlgmr.msra.gmra.mrb[0].mxu0 %vm295_vm1, %v250_v10  ;;  %749 = vmatmul.mubr.msk.bf16.vlgmr.msra.gmra.mrb[0].mxu1 %vm295_vm1, %v261_v15 }
  0x6b   : > { %765 = vmatpush3.bf16.msra.mxu0 %v865_v11  ;;  %772 = vmatprep.mubr.msk.bf16.mxu0 %vm1069_vm0, %v1068_v0 }
  0x6c   : > { %766 = vmatprep.subr.bf16.mxu0 %v1068_v0 }
  0x6f   : > { %767 = vmatpush3.bf16.msra.mxu0 %v867_v16 }
  0x70   : > { %768 = vmatprep.subr.bf16.mxu0 %v1068_v0 }
  0x73   : > { %769 = vmatpush3.bf16.msra.mxu0 %v869_v17 }
  0x74   : > { %770 = vmatprep.subr.bf16.mxu0 %v1068_v0 }
  0x77   : > { %771 = vmatpush3.bf16.msra.mxu0 %v871_v18 }
  0x7a   : > { %773 = vmatmul.mubr.msk.bf16.vlgmr.msra.gmra.mrb[0].mxu0 %vm295_vm1, %v410_v21 }
 0x13d   : > { %v333_v22 = vpop.f32.mrb[0].mxu1 }
 0x13e   : > { %v750_v23 = vpop.f32.mrb[1].mxu1 }
 0x13f   : > { %v336_v24 = vpop.f32.mrb[2].mxu1 }
 0x140   : > { %v751_v25 = vpop.f32.mrb[3].mxu1 }
 0x14d   : > { %v481_v26 = vpop.f32.mrb[0].mxu0 }
 0x14e   : > { %v776_v27 = vadd.f32 %v481_v26, %v333_v22  ;;  %v774_v28 = vpop.f32.mrb[1].mxu0 }
 0x14f   : > { %v484_v29 = vpop.f32.mrb[2].mxu0 }
 0x150   : > { %490 = vst [vmem:[%s234_s23] sm:$0xff] %v776_v27  ;;  %v777_v30 = vadd.f32 %v484_v29, %v336_v24  ;;  %v775_v31 = vpop.f32.mrb[3].mxu0  ;;  %v500_v32 = vmul.f32 %v776_v27, %v776_v27 }
 0x152   : > { %491 = vst [vmem:[%s234_s23 + $0x8] sm:$0xff] %v777_v30  ;;  %v492_v33 = vadd.f32 %v777_v30, %v776_v27  ;;  %v501_v34 = vmul.f32 %v777_v30, %v777_v30 }
 0x153   : > { %943 = shalt.err (!%p940_p7)
}
 0x154   : > { %s944_s24 = scalar_lea.hbm %s1274_s6, 256  ;;  %s948_s21 = scalar_lea.hbm %s1390_s2, 512 }
 0x155   : > { %p945_p9 = scmp.ne.s32.totalorder %s1274_s6, %s944_s24  ;;  %p949_p5 = scmp.lt.u32.totalorder %s1274_s6, %s1390_s2 }
 0x156   : > { %p950_p11 = scmp.lt.u32.totalorder %s948_s21, %s944_s24  ;;  %p952_p4 = scmp.lt.u32.totalorder %s944_s24, %s1274_s6 }
 0x157   : > { %p946_p2 = pnand %p945_p9, %p1193_p12 }
 0x158   : > { %p951_p1 = por %p950_p11, %p949_p5 }
 0x159   : > { %p947_p0 = pneg %p946_p2 }
 0x15a   : > { %p953_p6 = por %p952_p4, %p951_p1 }
 0x15c   : > { %p954_p8 = pnand %p953_p6, %p947_p0 }
 0x15e   : > { %957 = shalt.err (!%p954_p8)
}
 0x15f   : > { %s1071_s29 = smov 128   ;;  %s1072_s11 = smov 8   ;;  %v493_v35 = vrot.slane %v492_v33, 4  ;;  %v502_v36 = vadd.f32 %v501_v34, %v500_v32 }
 0x160   : > { %791 = dma.vmem_to_hbm [thread:$0]  (%p1193_p12), %s1269_s10, 256, %s1274_s6, %s511_s8, %s1071_s29, %s1071_s29, %s1072_s11  }
 0x161   : > { %v494_v37 = vadd.f32 %v493_v35, %v492_v33  ;;  %v503_v38 = vrot.slane %v502_v36, 4  ;;  %s515_s9 = sand.u32 1, %s1121_s19   ;;  %s720_s28 = sshll.u32 %s1121_s19, 4 }
 0x162   : > { %s240_s12 = scalar_lea.vmem [#allocation8], %s1241_s14  ;;  %s246_s24 = scalar_lea.vmem [#allocation10], %s1241_s14 }
 0x163   : > { %v495_v39 = vrot.slane %v494_v37, 2  ;;  %v504_v40 = vadd.f32 %v503_v38, %v502_v36  ;;  %s548_s13 = sshll.u32 %s240_s12, 4  ;;  %s561_s7 = sshll.u32 %s246_s24, 4  ;;  %s1311_s13 = int_to_ptr.vmem [resolvable:$true] %s548_s13  ;;  %s1318_s7 = int_to_ptr.vmem [resolvable:$true] %s561_s7 }
 0x164   : > { %s1309_s8 = scalar_lea.hbm %s1391_s3, %s720_s28  ;;  %s1316_s21 = scalar_lea.hbm %s1392_s4, %s720_s28 }
 0x165   : > { %v496_v41 = vadd.f32 %v495_v39, %v494_v37  ;;  %v505_v42 = vrot.slane %v504_v40, 2  ;;  %s1320_s23 = scalar_lea.sflag [#allocation9], %s515_s9  ;;  %s958_s25 = scalar_lea.vmem %s1311_s13, 16 }
 0x166   : > { %p959_p10 = scmp.ne.s32.totalorder %s1311_s13, %s958_s25  ;;  %s1073_s29 = smov [#allocation8]  }
 0x167   : > { %v497_v43 = vrot.slane %v496_v41, 1  ;;  %v506_v44 = vadd.f32 %v505_v42, %v504_v40  ;;  %s962_s11 = sshll.u32 %s1073_s29, 4  ;;  %s963_s11 = int_to_ptr.vmem [resolvable:$false] %s962_s11 }
 0x168   : > { %p960_p13 = pnand %p959_p10, %p1193_p12  ;;  %s964_s10 = scalar_lea.vmem %s963_s11, 32 }
 0x169   : > { %v507_v45 = vrot.slane %v506_v44, 1  ;;  %v498_v46 = vadd.f32 %v497_v43, %v496_v41  ;;  %p965_p7 = scmp.lt.s32.totalorder %s1311_s13, %s963_s11  ;;  %p966_p9 = scmp.lt.s32.totalorder %s964_s10, %s958_s25 }
 0x16a   : > { %p961_p3 = pneg %p960_p13 }
 0x16b   : > { %499 = vst [vmem:[%s240_s12] sm:$0x1] %v498_v46  ;;  %v508_v47 = vadd.f32 %v507_v45, %v506_v44  ;;  %p967_p2 = por %p966_p9, %p965_p7 }
 0x16d   : > { %p968_p0 = pnand %p967_p2, %p961_p3 }
 0x16f   : > { %971 = shalt.err (!%p968_p0)
}
 0x170   : > { %s972_s9 = scalar_lea.hbm %s1309_s8, 16  ;;  %s976_s6 = scalar_lea.hbm %s1391_s3, 32 }
 0x171   : > { %p973_p5 = scmp.ne.s32.totalorder %s1309_s8, %s972_s9  ;;  %p977_p4 = scmp.lt.u32.totalorder %s1309_s8, %s1391_s3 }
 0x172   : > { %p978_p6 = scmp.lt.u32.totalorder %s976_s6, %s972_s9  ;;  %p980_p10 = scmp.lt.u32.totalorder %s972_s9, %s1309_s8 }
 0x173   : > { %p974_p11 = pnand %p973_p5, %p1193_p12 }
 0x174   : > { %p979_p8 = por %p978_p6, %p977_p4 }
 0x175   : > { %p975_p1 = pneg %p974_p11 }
 0x176   : > { %p981_p13 = por %p980_p10, %p979_p8 }
 0x178   : > { %p982_p3 = pnand %p981_p13, %p975_p1 }
 0x17a   : > { %985 = shalt.err (!%p982_p3)
}
 0x17b   : > { %792 = dma.vmem_to_hbm [thread:$0]  (%p1193_p12), %s1311_s13, 16, %s1309_s8, %s1320_s23   ;;  %509 = vst [vmem:[%s246_s24] sm:$0x1] %v508_v47 }
 0x17c   : > { %s986_s25 = scalar_lea.vmem %s1318_s7, 16  ;;  %s1074_s29 = smov [#allocation10]  }
 0x17d   : > { %p987_p7 = scmp.ne.s32.totalorder %s1318_s7, %s986_s25  ;;  %s990_s11 = sshll.u32 %s1074_s29, 4  ;;  %s991_s11 = int_to_ptr.vmem [resolvable:$false] %s990_s11 }
 0x17e   : > { %s992_s10 = scalar_lea.vmem %s991_s11, 32  ;;  %p993_p0 = scmp.lt.s32.totalorder %s1318_s7, %s991_s11 }
 0x17f   : > { %p988_p9 = pnand %p987_p7, %p1193_p12  ;;  %p994_p5 = scmp.lt.s32.totalorder %s992_s10, %s986_s25 }
 0x181   : > { %p989_p2 = pneg %p988_p9  ;;  %p995_p11 = por %p994_p5, %p993_p0 }
 0x183   : > { %p996_p1 = pnand %p995_p11, %p989_p2 }
 0x185   : > { %999 = shalt.err (!%p996_p1)
}
 0x186   : > { %s1000_s14 = scalar_lea.hbm %s1316_s21, 16  ;;  %s1004_s8 = scalar_lea.hbm %s1392_s4, 32 }
 0x187   : > { %p1001_p4 = scmp.ne.s32.totalorder %s1316_s21, %s1000_s14  ;;  %p1005_p10 = scmp.lt.u32.totalorder %s1316_s21, %s1392_s4 }
 0x188   : > { %p1006_p13 = scmp.lt.u32.totalorder %s1004_s8, %s1000_s14  ;;  %p1008_p7 = scmp.lt.u32.totalorder %s1000_s14, %s1316_s21 }
 0x189   : > { %p1002_p6 = pnand %p1001_p4, %p1193_p12 }
 0x18a   : > { %p1007_p3 = por %p1006_p13, %p1005_p10 }
 0x18b   : > { %p1003_p8 = pneg %p1002_p6 }
 0x18c   : > { %p1009_p9 = por %p1008_p7, %p1007_p3 }
 0x18e   : > { %p1010_p2 = pnand %p1009_p9, %p1003_p8 }
 0x190   : > { %1013 = shalt.err (!%p1010_p2)
}
 0x191   : > { %793 = dma.vmem_to_hbm [thread:$0]  (%p1193_p12), %s1318_s7, 16, %s1316_s21, %s1320_s23  }
 0x192 PF: > { %s573_s12 = sand.u32 1, %s1048_s15   ;;  %p1407_p0 = scmp.ne.s32.totalorder %s1397_s22, 0 }
 0x193   : > { %p1408_p5 = scmp.ge.s32.totalorder %s1060_s18, 2  ;;  %s574_s6 = scalar_lea.sflag [#allocation4], %s573_s12 }
 0x195   : > { %p806_p11 = pnand %p1408_p5, %p1407_p0 }
 0x197   : > { %1039 = dma.done.wait (!%p806_p11), %s574_s6, 256  }
 0x198   : > { %1041 = vsyncadd (!%p806_p11), %s574_s6, 4294967040  ;;  %s582_s19 = sand.u32 1, %s694_s20  }
 0x199   : > { %s583_s26 = scalar_lea.sflag [#allocation9], %s582_s19 }
 0x19a   : > { %1043 = dma.done.wait (!%p806_p11), %s583_s26, 32  }
 0x19b   : > { %1045 = vsyncadd (!%p806_p11), %s583_s26, 4294967264  ;;  %p22_p12 = scmp.ge.s32.totalorder %s1158_s27, 4   ;;  %s1409_s15 = smov %s1052_s16 }
 0x19c   : > { %s1410_s16 = smov %s1056_s17  ;;  %s1411_s17 = smov %s1189_s30 }
 0x19d   : > { %s1412_s18 = smov %s1158_s27  ;;  %24 = sbr.rel (!%p22_p12) target bundleno = 8 (0x8), region = 111 }
 0x1a4   :  { %595 = vsyncpa [#allocation3], 1 }
 0x1a5   :  { %597 = vsyncpa [#allocation3 + $0x1], 1 }
 0x1a6   :  { %598 = vsyncpa [#allocation6], 1 }
 0x1a7   :  { %599 = vsyncpa [#allocation4], 1 }
 0x1a8   :  { %601 = vsyncpa [#allocation4 + $0x1], 1 }
 0x1a9   :  { %602 = vsyncpa [#allocation9], 1 }
 0x1aa   :  { %604 = vsyncpa [#allocation9 + $0x1], 1 }

// kernel: resnet_block.4
= control target key start
LH: loop header
LB: loop body
LE: loop exit
PB: predicated region body
PF: predicated region fallthrough
CT: control target
= control target key end

     0   :  { %12 = vsyncpa [#allocation4], 0  ;;  %s1831_s0 = inlined_call_operand.hbm [shape: f32[2,16,128], index: 0, kind: input, shape index: {}]   ;;  %s1832_s1 = inlined_call_operand.hbm [shape: f32[1,128], index: 1, kind: input, shape index: {}]   ;;  %s1833_s2 = inlined_call_operand.hbm [shape: f32[1,128], index: 2, kind: input, shape index: {}]   ;;  %s1834_s3 = inlined_call_operand.hbm [shape: bf16[3,128,128], index: 3, kind: input, shape index: {}]   ;;  %s1835_s4 = inlined_call_operand.hbm [shape: f32[2,16,128], index: 4, kind: output, shape index: {0}]   ;;  %s1836_s5 = inlined_call_operand.hbm [shape: f32[2,1,128], index: 5, kind: output, shape index: {1}]   ;;  %s1837_s6 = inlined_call_operand.hbm [shape: f32[2,1,128], index: 6, kind: output, shape index: {2}]  }
   0x1   :  { %14 = vsyncpa [#allocation4 + $0x1], 0 }
   0x2   :  { %15 = vsyncpa [#allocation7], 0 }
   0x3   :  { %16 = vsyncpa [#allocation10], 0 }
   0x4   :  { %17 = vsyncpa [#allocation5], 0 }
   0x5   :  { %19 = vsyncpa [#allocation5 + $0x1], 0 }
   0x6   :  { %20 = vsyncpa [#allocation13], 0 }
   0x7   :  { %22 = vsyncpa [#allocation13 + $0x1], 0  ;;  %s1466_s21 = smov 0   ;;  %s1468_s22 = smov 0  }
   0x8   :  { %s1470_s23 = smov 0   ;;  %s1472_s24 = smov 0  }
   0x9 LB: > { %s1487_s25 = sadd.s32 4294967295, %s1414_s24   ;;  %s1841_s26 = sadd.s32 4294967294, %s1414_s24   ;;  %s1414_s24 = sphi %s1472_s24, %s1862_s24   ;;  %s1410_s23 = sphi %s1470_s23, %s1861_s23   ;;  %s1406_s22 = sphi %s1468_s22, %s1860_s22   ;;  %s1402_s21 = sphi %s1466_s21, %s1859_s21  }
   0xa   : > { %p48_p0 = scmp.ne.s32.totalorder %s1406_s22, %s1402_s21  ;;  %p1838_p1 = scmp.eq.s32.totalorder %s1487_s25, 0 }
   0xb   : > { %p141_p3 = scmp.eq.s32.totalorder %s1841_s26, 1  ;;  %p905_p5 = scmp.ge.s32.totalorder %s1414_s24, 1 }
   0xc   : > { %p1498_p4 = por %p1838_p1, %p48_p0  ;;  %p200_p7 = scmp.lt.s32.totalorder %s1414_s24, 3 }
   0xd   : > { %p1503_p6 = por %p141_p3, %p48_p0  ;;  %s1416_s30 = smov [#allocation6]  }
   0xe   : > { %s1842_s27 = scalar_select %p1498_p4, 1, 0 }
   0xf   : > { %s1843_s28 = scalar_select %p1503_p6, 1, 0 }
  0x10   : > { %p1508_p8 = pnand %p905_p5, %p200_p7  ;;  %s213_s7 = sshll.u32 %s1416_s30, 4  ;;  %s214_s7 = int_to_ptr.vmem [resolvable:$true] %s213_s7 }
  0x11   : > { %s1417_s8 = smov [#allocation8]   ;;  %s1418_s11 = smov [#allocation9]  }
  0x12   : > { %s1844_s29 = scalar_select %p1508_p8, 1, 0 }
  0x13   : > { %p1067_p10 = pneg %p1508_p8  ;;  %s224_s9 = sshll.u32 %s1417_s8, 4  ;;  %s1521_s9 = int_to_ptr.vmem [resolvable:$true] %s224_s9 }
  0x14   : > { %s234_s12 = sshll.u32 %s1418_s11, 4  ;;  %s1166_s15 = scalar_lea.hbm %s1832_s1, 16  ;;  %s1523_s12 = int_to_ptr.vmem [resolvable:$true] %s234_s12 }
  0x15   : > { %p1517_p11 = pnand %p1067_p10, %p1838_p1  ;;  %p1167_p12 = scmp.ne.s32.totalorder %s1832_s1, %s1166_s15 }
  0x16   : > { %p1173_p5 = scmp.lt.u32.totalorder %s1166_s15, %s1832_s1 }
  0x17   : > { %p1533_p13 = pneg %p1517_p11 }
  0x19   : > { %p1169_p0 = pnand %p1533_p13, %p1167_p12 }
  0x1b   : > { %p1170_p3 = pneg %p1169_p0 }
  0x1d   : > { %p1175_p7 = pnand %p1173_p5, %p1170_p3 }
  0x1f   : > { %1178 = shalt.err (!%p1175_p7)
}
  0x20   : > { %s1179_s30 = scalar_lea.vmem %s214_s7, 16  ;;  %s1186_s8 = scalar_lea.vmem %s214_s7, 32 }
  0x21   : > { %p1180_p10 = scmp.ne.s32.totalorder %s214_s7, %s1179_s30  ;;  %p1187_p2 = scmp.lt.s32.totalorder %s214_s7, %s214_s7 }
  0x22   : > { %p1188_p6 = scmp.lt.s32.totalorder %s1186_s8, %s1179_s30 }
  0x23   : > { %p1182_p9 = pnand %p1180_p10, %p1533_p13 }
  0x24   : > { %p1189_p4 = por %p1188_p6, %p1187_p2 }
  0x25   : > { %p1183_p1 = pneg %p1182_p9 }
  0x27   : > { %p1190_p8 = pnand %p1189_p4, %p1183_p1 }
  0x29   : > { %1193 = shalt.err (!%p1190_p8)
}
  0x2a   : > { %1070 = dma.hbm_to_vmem [thread:$0]  (!%p1517_p11), %s1832_s1, 16, %s214_s7, [#allocation7]  }
  0x2b   : > { %s1194_s16 = scalar_lea.hbm %s1833_s2, 16 }
  0x2c   : > { %p1195_p9 = scmp.ne.s32.totalorder %s1833_s2, %s1194_s16  ;;  %p1201_p1 = scmp.lt.u32.totalorder %s1194_s16, %s1833_s2 }
  0x2e   : > { %p1197_p12 = pnand %p1195_p9, %p1533_p13 }
  0x30   : > { %p1198_p2 = pneg %p1197_p12 }
  0x32   : > { %p1203_p4 = pnand %p1201_p1, %p1198_p2 }
  0x34   : > { %1206 = shalt.err (!%p1203_p4)
}
  0x35   : > { %s1207_s7 = scalar_lea.vmem %s1521_s9, 16  ;;  %s1214_s8 = scalar_lea.vmem %s1521_s9, 32 }
  0x36   : > { %p1208_p6 = scmp.ne.s32.totalorder %s1521_s9, %s1207_s7  ;;  %p1215_p3 = scmp.lt.s32.totalorder %s1521_s9, %s1521_s9 }
  0x37   : > { %p1216_p5 = scmp.lt.s32.totalorder %s1214_s8, %s1207_s7 }
  0x38   : > { %p1210_p8 = pnand %p1208_p6, %p1533_p13 }
  0x39   : > { %p1217_p7 = por %p1216_p5, %p1215_p3 }
  0x3a   : > { %p1211_p0 = pneg %p1210_p8 }
  0x3c   : > { %p1218_p10 = pnand %p1217_p7, %p1211_p0 }
  0x3e   : > { %1221 = shalt.err (!%p1218_p10)
}
  0x3f   : > { %1073 = dma.hbm_to_vmem [thread:$0]  (!%p1517_p11), %s1833_s2, 16, %s1521_s9, [#allocation7]  }
  0x40   : > { %s1222_s16 = scalar_lea.hbm %s1834_s3, 3072 }
  0x41   : > { %p1223_p9 = scmp.ne.s32.totalorder %s1834_s3, %s1222_s16  ;;  %p1229_p1 = scmp.lt.u32.totalorder %s1222_s16, %s1834_s3 }
  0x43   : > { %p1225_p12 = pnand %p1223_p9, %p1533_p13 }
  0x45   : > { %p1226_p2 = pneg %p1225_p12 }
  0x47   : > { %p1231_p4 = pnand %p1229_p1, %p1226_p2 }
  0x49   : > { %1234 = shalt.err (!%p1231_p4)
}
  0x4a   : > { %s1235_s9 = scalar_lea.vmem %s1523_s12, 3072  ;;  %p1243_p3 = scmp.lt.s32.totalorder %s1523_s12, %s1523_s12 }
  0x4b   : > { %p1236_p6 = scmp.ne.s32.totalorder %s1523_s12, %s1235_s9  ;;  %p1244_p5 = scmp.lt.s32.totalorder %s1235_s9, %s1235_s9 }
  0x4d   : > { %p1238_p8 = pnand %p1236_p6, %p1533_p13  ;;  %p1245_p7 = por %p1244_p5, %p1243_p3 }
  0x4f   : > { %p1239_p0 = pneg %p1238_p8 }
  0x51   : > { %p1246_p10 = pnand %p1245_p7, %p1239_p0 }
  0x53   : > { %1249 = shalt.err (!%p1246_p10)
}
  0x54   : > { %s1419_s7 = smov 64   ;;  %s1420_s18 = smov 4  }
  0x55   : > { %1076 = dma.hbm_to_vmem [thread:$0]  (!%p1517_p11), %s1834_s3, 3072, %s1523_s12, [#allocation10], %s1419_s7, %s1419_s7, %s1420_s18  }
  0x56   : > { %s1597_s13 = sadd.s32 1, %s1414_s24   ;;  %s35_s15 = sadd.s32 1, %s1410_s23 }
  0x57   : > { %s32_s14 = ssub.s32 %s1414_s24, %s1597_s13  ;;  %p42_p9 = scmp.ne.s32.totalorder %s1410_s23, %s1406_s22 }
  0x58   : > { %p33_p13 = scmp.eq.s32.totalorder %s32_s14, 0  ;;  %p43_p12 = scmp.eq.s32.totalorder %s1414_s24, 0 }
  0x59   : > { %p1094_p2 = scmp.lt.s32.totalorder %s1414_s24, 2  ;;  %p1847_p4 = scmp.eq.s32.totalorder %s1487_s25, 1 }
  0x5a   : > { %s1607_s16 = scalar_select %p33_p13, %s1410_s23, %s35_s15  }
  0x5b   : > { %p44_p1 = por %p43_p12, %p42_p9  ;;  %p1611_p6 = por %p1847_p4, %p42_p9 }
  0x5c   : > { %s248_s10 = sand.u32 1, %s1410_s23   ;;  %s952_s19 = sshll.u32 %s1414_s24, 8 }
  0x5d   : > { %s910_s12 = sshll.u32 %s248_s10, 4  ;;  %s1620_s9 = scalar_lea.hbm %s1831_s0, %s952_s19 }
  0x5e   : > { %s252_s7 = scalar_lea.vmem [#allocation3], %s910_s12  ;;  %p1622_p11 = pnand %p1094_p2, %p44_p1 }
  0x5f   : > { %s259_s18 = sshll.u32 %s252_s7, 4  ;;  %s1628_s11 = scalar_lea.sflag [#allocation4], %s248_s10  ;;  %s1626_s18 = int_to_ptr.vmem [resolvable:$true] %s259_s18 }
  0x60   : > { %s1250_s14 = scalar_lea.hbm %s1620_s9, 256  ;;  %p1252_p0 = pneg %p1622_p11 }
  0x61   : > { %p1251_p8 = scmp.ne.s32.totalorder %s1620_s9, %s1250_s14  ;;  %s1255_s12 = scalar_lea.hbm %s1831_s0, 512 }
  0x62   : > { %p1256_p7 = scmp.lt.u32.totalorder %s1620_s9, %s1831_s0  ;;  %p1257_p10 = scmp.lt.u32.totalorder %s1255_s12, %s1250_s14 }
  0x63   : > { %p1253_p3 = pnand %p1252_p0, %p1251_p8  ;;  %p1259_p9 = scmp.lt.u32.totalorder %s1250_s14, %s1620_s9 }
  0x64   : > { %p1258_p13 = por %p1257_p10, %p1256_p7 }
  0x65   : > { %p1254_p5 = pneg %p1253_p3 }
  0x66   : > { %p1260_p12 = por %p1259_p9, %p1258_p13 }
  0x68   : > { %p1261_p2 = pnand %p1260_p12, %p1254_p5 }
  0x6a   : > { %1264 = shalt.err (!%p1261_p2)
}
  0x6b   : > { %s1265_s10 = scalar_lea.vmem %s1626_s18, 256  ;;  %s1421_s7 = smov [#allocation3]  }
  0x6c   : > { %p1266_p1 = scmp.ne.s32.totalorder %s1626_s18, %s1265_s10  ;;  %s1270_s15 = sshll.u32 %s1421_s7, 4  ;;  %s1271_s15 = int_to_ptr.vmem [resolvable:$false] %s1270_s15 }
  0x6d   : > { %s1272_s19 = scalar_lea.vmem %s1271_s15, 512  ;;  %p1273_p3 = scmp.lt.s32.totalorder %s1626_s18, %s1271_s15 }
  0x6e   : > { %p1268_p4 = pnand %p1266_p1, %p1252_p0  ;;  %p1274_p7 = scmp.lt.s32.totalorder %s1272_s19, %s1265_s10 }
  0x70   : > { %p1269_p8 = pneg %p1268_p4  ;;  %p1275_p10 = por %p1274_p7, %p1273_p3 }
  0x72   : > { %p1276_p13 = pnand %p1275_p10, %p1269_p8 }
  0x74   : > { %1279 = shalt.err (!%p1276_p13)
}
  0x75   : > { %s1422_s14 = smov 128   ;;  %s1423_s12 = smov 8  }
  0x76   : > { %1080 = dma.hbm_to_vmem [thread:$0]  (!%p1622_p11), %s1620_s9, 256, %s1626_s18, %s1628_s11, %s1422_s14, %s1422_s14, %s1423_s12  }
  0x77   : > { %p1850_p0 = scmp.ne.s32.totalorder %s1844_s29, 0 }
  0x78   : > { %s1659_s20 = sand.u32 (!%p1850_p0), 1, %s1406_s22   ;;  %p1851_p5 = scmp.ne.s32.totalorder (!%p1850_p0), %s1842_s27, 0 }
  0x79   : > { %271 = sbr.rel (%p1850_p0) target bundleno = 482 (0x1e2), region = 36  ;;  %s914_s30 = sshll.u32 (!%p1850_p0), %s1659_s20, 4 }
  0x7a   : > { %s274_s10 = scalar_lea.sflag (!%p1850_p0), [#allocation4], %s1659_s20  ;;  %s277_s7 = scalar_lea.vmem (!%p1850_p0), [#allocation3], %s914_s30 }
  0x80   : > { %1381 = dma.done.wait (%p1851_p5), %s274_s10, 256  }
  0x81   : > { %1383 = vsyncadd (%p1851_p5), %s274_s10, 4294967040  ;;  %p1852_p11 = scmp.eq.s32.totalorder %s1487_s25, 0 }
  0x83   : > { %1385 = dma.done.wait (%p1852_p11), [#allocation7], 32   ;;  %p1853_p9 = pmov %p1852_p11 }
  0x85   : > { %1387 = vsyncadd (%p1853_p9), [#allocation7], 4294967264  ;;  %p1854_p12 = pmov %p1853_p9 }
  0x86   : > { %p1855_p2 = pmov %p1853_p9 }
  0x87   : > { %1389 = dma.done.wait (%p1854_p12), [#allocation10], 3072  }
  0x88   : > { %1391 = vsyncadd (%p1855_p2), [#allocation10], 4294964224  ;;  %v1424_v0 = vmov 0.0   ;;  %vm1425_vm0 = vmmov 0   ;;  %v1142_v1 = vld [vmem:[#allocation9] sm:$0xff]   ;;  %v1143_v2 = vld [vmem:[#allocation9 + $0x8] sm:$0xff]  }
  0x89   : > { %1001 = vmatprep.subr.bf16.mxu0 %v1424_v0  ;;  %349 = vst [vmem:[#allocation2] sm:$0x1] %v1424_v0  ;;  %350 = vst [vmem:[#allocation2 + $0x11] sm:$0x1] %v1424_v0  ;;  %981 = vmatprep.subr.bf16.mxu1 %v1424_v0  ;;  %v1144_v3 = vld [vmem:[#allocation9 + $0x10] sm:$0xff]   ;;  %v1145_v4 = vld [vmem:[#allocation9 + $0x18] sm:$0xff]  }
  0x8a   : > { %1017 = vmatprep.mubr.msk.bf16.mxu0 %vm1425_vm0, %v1424_v0  ;;  %997 = vmatprep.mubr.msk.bf16.mxu1 %vm1425_vm0, %v1424_v0  ;;  %v1150_v5 = vld [vmem:[#allocation9 + $0x40] sm:$0xff]   ;;  %v919_v8 = vld [vmem:[#allocation6] ss:$0 sm:$0xff]  ;;  %v920_v11 = vld [vmem:[#allocation8] ss:$0 sm:$0xff]  ;;  %s313_s27 = scalar_lea.vmem [#allocation11], %s914_s30 }
  0x8b   : > { %1002 = vmatpush3.bf16.msra.mxu0 %v1142_v1  ;;  %v327_v6 = vld [vmem:[%s277_s7] sm:$0xff]  ;;  %v328_v7 = vld [vmem:[%s277_s7 + $0x8] sm:$0xff]  ;;  %982 = vmatpush3.bf16.msra.mxu1 %v1150_v5  ;;  %s723_s29 = sshll.u32 %s313_s27, 4  ;;  %s953_s9 = sshll.u32 %s1487_s25, 8  ;;  %s1712_s29 = int_to_ptr.vmem [resolvable:$true] %s723_s29 }
  0x8c   : > { %1003 = vmatprep.subr.bf16.mxu0 %v1424_v0  ;;  %v336_v9 = vmul.f32 %v919_v8, %v327_v6  ;;  %v337_v10 = vmul.f32 %v919_v8, %v328_v7  ;;  %983 = vmatprep.subr.bf16.mxu1 %v1424_v0  ;;  %v1152_v14 = vld [vmem:[#allocation9 + $0x48] sm:$0xff]   ;;  %v1146_v15 = vld [vmem:[#allocation9 + $0x20] sm:$0xff]   ;;  %v1154_v18 = vld [vmem:[#allocation9 + $0x50] sm:$0xff]   ;;  %s1717_s11 = scalar_lea.hbm %s1835_s4, %s953_s9  ;;  %s702_s15 = scalar_lea.sflag [#allocation5], %s1659_s20 }
  0x8d   : > { %v1147_v19 = vld [vmem:[#allocation9 + $0x28] sm:$0xff]   ;;  %v1156_v20 = vld [vmem:[#allocation9 + $0x58] sm:$0xff]   ;;  %v1148_v21 = vld [vmem:[#allocation9 + $0x30] sm:$0xff]   ;;  %s1280_s19 = scalar_lea.vmem %s1712_s29, 256  ;;  %s1426_s14 = smov [#allocation11]  }
  0x8e   : > { %v345_v12 = vadd.f32 %v920_v11, %v336_v9  ;;  %v346_v13 = vadd.f32 %v920_v11, %v337_v10  ;;  %v1158_v22 = vld [vmem:[#allocation9 + $0x60] sm:$0xff]   ;;  %v1149_v23 = vld [vmem:[#allocation9 + $0x38] sm:$0xff]   ;;  %v1160_v26 = vld [vmem:[#allocation9 + $0x68] sm:$0xff]   ;;  %p1281_p1 = scmp.ne.s32.totalorder %s1712_s29, %s1280_s19  ;;  %s1284_s12 = sshll.u32 %s1426_s14, 4  ;;  %s1285_s12 = int_to_ptr.vmem [resolvable:$false] %s1284_s12 }
  0x8f   : > { %1004 = vmatpush3.bf16.msra.mxu0 %v1143_v2  ;;  %984 = vmatpush3.bf16.msra.mxu1 %v1152_v14  ;;  %v1151_v28 = vld [vmem:[#allocation9 + $0x80] sm:$0xff]   ;;  %v1162_v29 = vld [vmem:[#allocation9 + $0x70] sm:$0xff]   ;;  %v1153_v30 = vld [vmem:[#allocation9 + $0x88] sm:$0xff]   ;;  %s1286_s30 = scalar_lea.vmem %s1285_s12, 512  ;;  %p1287_p3 = scmp.lt.s32.totalorder %s1712_s29, %s1285_s12 }
  0x90   : > { %1005 = vmatprep.subr.bf16.mxu0 %v1424_v0  ;;  %v347_v16 = vmax.f32 %v345_v12, 0.0  ;;  %v348_v17 = vmax.f32 %v346_v13, 0.0  ;;  %985 = vmatprep.subr.bf16.mxu1 %v1424_v0  ;;  %v1164_v31 = vld [vmem:[#allocation9 + $0x78] sm:$0xff]   ;;  %v1155_v33 = vld [vmem:[#allocation9 + $0x90] sm:$0xff]   ;;  %v1159_v35 = vld [vmem:[#allocation9 + $0xa0] sm:$0xff]   ;;  %p1282_p4 = pnand %p1281_p1, %p1611_p6  ;;  %p1288_p7 = scmp.lt.s32.totalorder %s1286_s30, %s1280_s19 }
  0x91   : > { %v1157_v34 = vld [vmem:[#allocation9 + $0x98] sm:$0xff]   ;;  %v1161_v36 = vld [vmem:[#allocation9 + $0xa8] sm:$0xff]   ;;  %v1163_v37 = vld [vmem:[#allocation9 + $0xb0] sm:$0xff]  }
  0x92   : > { %351 = vst [vmem:[#allocation2 + $0x1] sm:$0xff] %v347_v16  ;;  %352 = vst [vmem:[#allocation2 + $0x9] sm:$0xff] %v348_v17  ;;  %v374_v32 = vpack.c.bf16 %v348_v17, %v347_v16  ;;  %v1165_v38 = vld [vmem:[#allocation9 + $0xb8] sm:$0xff]   ;;  %p1283_p8 = pneg %p1282_p4  ;;  %p1289_p10 = por %p1288_p7, %p1287_p3 }
  0x93   : > { %1006 = vmatpush3.bf16.msra.mxu0 %v1144_v3  ;;  %986 = vmatpush3.bf16.msra.mxu1 %v1154_v18 }
  0x94   : > { %1007 = vmatprep.subr.bf16.mxu0 %v1424_v0  ;;  %987 = vmatprep.subr.bf16.mxu1 %v1424_v0  ;;  %p1290_p13 = pnand %p1289_p10, %p1283_p8 }
  0x97   : > { %1008 = vmatpush3.bf16.msra.mxu0 %v1145_v4  ;;  %988 = vmatpush3.bf16.msra.mxu1 %v1156_v20 }
  0x98   : > { %1009 = vmatprep.subr.bf16.mxu0 %v1424_v0  ;;  %989 = vmatprep.subr.bf16.mxu1 %v1424_v0 }
  0x99   : > { %v353_v24 = vld [vmem:[#allocation2] sm:$0xff]  ;;  %v354_v25 = vld [vmem:[#allocation2 + $0x8] sm:$0xff] }
  0x9a   : > { %v355_v27 = vpack.c.bf16 %v354_v25, %v353_v24  ;;  %v570_v39 = vld [vmem:[#allocation2 + $0x2] sm:$0xff]  ;;  %v571_v40 = vld [vmem:[#allocation2 + $0xa] sm:$0xff] }
  0x9b   : > { %1010 = vmatpush3.bf16.msra.mxu0 %v1146_v15  ;;  %990 = vmatpush3.bf16.msra.mxu1 %v1158_v22  ;;  %v572_v41 = vpack.c.bf16 %v571_v40, %v570_v39 }
  0x9c   : > { %1011 = vmatprep.subr.bf16.mxu0 %v1424_v0  ;;  %991 = vmatprep.subr.bf16.mxu1 %v1424_v0 }
  0x9f   : > { %1012 = vmatpush3.bf16.msra.mxu0 %v1147_v19  ;;  %992 = vmatpush3.bf16.msra.mxu1 %v1160_v26 }
  0xa0   : > { %1013 = vmatprep.subr.bf16.mxu0 %v1424_v0  ;;  %993 = vmatprep.subr.bf16.mxu1 %v1424_v0 }
  0xa3   : > { %1014 = vmatpush3.bf16.msra.mxu0 %v1148_v21  ;;  %994 = vmatpush3.bf16.msra.mxu1 %v1162_v29 }
  0xa4   : > { %1015 = vmatprep.subr.bf16.mxu0 %v1424_v0  ;;  %995 = vmatprep.subr.bf16.mxu1 %v1424_v0 }
  0xa7   : > { %1016 = vmatpush3.bf16.msra.mxu0 %v1149_v23  ;;  %996 = vmatpush3.bf16.msra.mxu1 %v1164_v31 }
  0xa8   : > { %1021 = vmatprep.subr.bf16.mxu0 %v1424_v0 }
  0xaa   : > { %1018 = vmatmul.mubr.bf16.vlgmr.msra.gmra.mrb[0].mxu0 %v355_v27  ;;  %998 = vmatmul.mubr.bf16.vlgmr.msra.gmra.mrb[0].mxu1 %v374_v32 }
  0xab   : > { %1022 = vmatpush3.bf16.msra.mxu0 %v1151_v28  ;;  %1037 = vmatprep.mubr.msk.bf16.mxu0 %vm1425_vm0, %v1424_v0 }
  0xac   : > { %1023 = vmatprep.subr.bf16.mxu0 %v1424_v0 }
  0xaf   : > { %1024 = vmatpush3.bf16.msra.mxu0 %v1153_v30 }
  0xb0   : > { %1025 = vmatprep.subr.bf16.mxu0 %v1424_v0 }
  0xb3   : > { %1026 = vmatpush3.bf16.msra.mxu0 %v1155_v33 }
  0xb4   : > { %1027 = vmatprep.subr.bf16.mxu0 %v1424_v0 }
  0xb7   : > { %1028 = vmatpush3.bf16.msra.mxu0 %v1157_v34 }
  0xb8   : > { %1029 = vmatprep.subr.bf16.mxu0 %v1424_v0 }
  0xbb   : > { %1030 = vmatpush3.bf16.msra.mxu0 %v1159_v35 }
  0xbc   : > { %1031 = vmatprep.subr.bf16.mxu0 %v1424_v0 }
  0xbf   : > { %1032 = vmatpush3.bf16.msra.mxu0 %v1161_v36 }
  0xc0   : > { %1033 = vmatprep.subr.bf16.mxu0 %v1424_v0 }
  0xc3   : > { %1034 = vmatpush3.bf16.msra.mxu0 %v1163_v37 }
  0xc4   : > { %1035 = vmatprep.subr.bf16.mxu0 %v1424_v0 }
  0xc7   : > { %1036 = vmatpush3.bf16.msra.mxu0 %v1165_v38 }
  0xca   : > { %1038 = vmatmul.mubr.bf16.vlgmr.msra.gmra.mrb[0].mxu0 %v572_v41 }
 0x17d   : > { %v474_v42 = vpop.f32.mrb[0].mxu1 }
 0x17e   : > { %v999_v43 = vpop.f32.mrb[1].mxu1 }
 0x17f   : > { %v477_v44 = vpop.f32.mrb[2].mxu1 }
 0x180   : > { %v1000_v45 = vpop.f32.mrb[3].mxu1 }
 0x19d   : > { %v672_v46 = vpop.f32.mrb[0].mxu0 }
 0x19e   : > { %v1041_v47 = vadd.f32 %v672_v46, %v474_v42  ;;  %v1039_v48 = vpop.f32.mrb[1].mxu0 }
 0x19f   : > { %v675_v49 = vpop.f32.mrb[2].mxu0 }
 0x1a0   : > { %681 = vst [vmem:[%s313_s27] sm:$0xff] %v1041_v47  ;;  %v1042_v50 = vadd.f32 %v675_v49, %v477_v44  ;;  %v1040_v51 = vpop.f32.mrb[3].mxu0  ;;  %v691_v52 = vmul.f32 %v1041_v47, %v1041_v47 }
 0x1a2   : > { %682 = vst [vmem:[%s313_s27 + $0x8] sm:$0xff] %v1042_v50  ;;  %v683_v53 = vadd.f32 %v1042_v50, %v1041_v47  ;;  %v692_v54 = vmul.f32 %v1042_v50, %v1042_v50 }
 0x1a3   : > { %1293 = shalt.err (!%p1290_p13)
}
 0x1a4   : > { %s1294_s10 = scalar_lea.hbm %s1717_s11, 256  ;;  %s1298_s9 = scalar_lea.hbm %s1835_s4, 512 }
 0x1a5   : > { %p1295_p0 = scmp.ne.s32.totalorder %s1717_s11, %s1294_s10  ;;  %p1299_p9 = scmp.lt.u32.totalorder %s1717_s11, %s1835_s4 }
 0x1a6   : > { %p1300_p12 = scmp.lt.u32.totalorder %s1298_s9, %s1294_s10  ;;  %p1302_p1 = scmp.lt.u32.totalorder %s1294_s10, %s1717_s11 }
 0x1a7   : > { %p1296_p5 = pnand %p1295_p0, %p1611_p6 }
 0x1a8   : > { %p1301_p2 = por %p1300_p12, %p1299_p9 }
 0x1a9   : > { %p1297_p11 = pneg %p1296_p5 }
 0x1aa   : > { %p1303_p4 = por %p1302_p1, %p1301_p2 }
 0x1ac   : > { %p1304_p8 = pnand %p1303_p4, %p1297_p11 }
 0x1ae   : > { %1307 = shalt.err (!%p1304_p8)
}
 0x1af   : > { %s1427_s19 = smov 128   ;;  %s1428_s14 = smov 8   ;;  %v684_v55 = vrot.slane %v683_v53, 4  ;;  %v693_v56 = vadd.f32 %v692_v54, %v691_v52 }
 0x1b0   : > { %1061 = dma.vmem_to_hbm [thread:$0]  (%p1611_p6), %s1712_s29, 256, %s1717_s11, %s702_s15, %s1427_s19, %s1427_s19, %s1428_s14  }
 0x1b1   : > { %v685_v57 = vadd.f32 %v684_v55, %v683_v53  ;;  %v694_v58 = vrot.slane %v693_v56, 4  ;;  %s706_s12 = sand.u32 1, %s1487_s25   ;;  %s948_s30 = sshll.u32 %s1487_s25, 4 }
 0x1b2   : > { %s319_s10 = scalar_lea.vmem [#allocation12], %s1659_s20  ;;  %s325_s27 = scalar_lea.vmem [#allocation14], %s1659_s20 }
 0x1b3   : > { %v686_v59 = vrot.slane %v685_v57, 2  ;;  %v695_v60 = vadd.f32 %v694_v58, %v693_v56  ;;  %s739_s7 = sshll.u32 %s319_s10, 4  ;;  %s752_s9 = sshll.u32 %s325_s27, 4  ;;  %s1754_s7 = int_to_ptr.vmem [resolvable:$true] %s739_s7  ;;  %s1761_s9 = int_to_ptr.vmem [resolvable:$true] %s752_s9 }
 0x1b4   : > { %s1752_s15 = scalar_lea.hbm %s1836_s5, %s948_s30  ;;  %s1759_s8 = scalar_lea.hbm %s1837_s6, %s948_s30 }
 0x1b5   : > { %v687_v61 = vadd.f32 %v686_v59, %v685_v57  ;;  %v696_v62 = vrot.slane %v695_v60, 2  ;;  %s1763_s19 = scalar_lea.sflag [#allocation13], %s706_s12  ;;  %s1308_s14 = scalar_lea.vmem %s1754_s7, 16 }
 0x1b6   : > { %p1309_p3 = scmp.ne.s32.totalorder %s1754_s7, %s1308_s14  ;;  %s1429_s29 = smov [#allocation12]  }
 0x1b7   : > { %v688_v63 = vrot.slane %v687_v61, 1  ;;  %v697_v0 = vadd.f32 %v696_v62, %v695_v60  ;;  %s1312_s11 = sshll.u32 %s1429_s29, 4  ;;  %s1313_s11 = int_to_ptr.vmem [resolvable:$false] %s1312_s11 }
 0x1b8   : > { %p1310_p7 = pnand %p1309_p3, %p1611_p6  ;;  %s1314_s26 = scalar_lea.vmem %s1313_s11, 32 }
 0x1b9   : > { %v698_v1 = vrot.slane %v697_v0, 1  ;;  %v689_v2 = vadd.f32 %v688_v63, %v687_v61  ;;  %p1315_p13 = scmp.lt.s32.totalorder %s1754_s7, %s1313_s11  ;;  %p1316_p0 = scmp.lt.s32.totalorder %s1314_s26, %s1308_s14 }
 0x1ba   : > { %p1311_p10 = pneg %p1310_p7 }
 0x1bb   : > { %690 = vst [vmem:[%s319_s10] sm:$0x1] %v689_v2  ;;  %v699_v3 = vadd.f32 %v698_v1, %v697_v0  ;;  %p1317_p5 = por %p1316_p0, %p1315_p13 }
 0x1bd   : > { %p1318_p11 = pnand %p1317_p5, %p1311_p10 }
 0x1bf   : > { %1321 = shalt.err (!%p1318_p11)
}
 0x1c0   : > { %s1322_s12 = scalar_lea.hbm %s1752_s15, 16  ;;  %s1326_s25 = scalar_lea.hbm %s1836_s5, 32 }
 0x1c1   : > { %p1323_p9 = scmp.ne.s32.totalorder %s1752_s15, %s1322_s12  ;;  %p1327_p1 = scmp.lt.u32.totalorder %s1752_s15, %s1836_s5 }
 0x1c2   : > { %p1328_p4 = scmp.lt.u32.totalorder %s1326_s25, %s1322_s12  ;;  %p1330_p3 = scmp.lt.u32.totalorder %s1322_s12, %s1752_s15 }
 0x1c3   : > { %p1324_p12 = pnand %p1323_p9, %p1611_p6 }
 0x1c4   : > { %p1329_p8 = por %p1328_p4, %p1327_p1 }
 0x1c5   : > { %p1325_p2 = pneg %p1324_p12 }
 0x1c6   : > { %p1331_p7 = por %p1330_p3, %p1329_p8 }
 0x1c8   : > { %p1332_p10 = pnand %p1331_p7, %p1325_p2 }
 0x1ca   : > { %1335 = shalt.err (!%p1332_p10)
}
 0x1cb   : > { %1062 = dma.vmem_to_hbm [thread:$0]  (%p1611_p6), %s1754_s7, 16, %s1752_s15, %s1763_s19   ;;  %700 = vst [vmem:[%s325_s27] sm:$0x1] %v699_v3 }
 0x1cc   : > { %s1336_s26 = scalar_lea.vmem %s1761_s9, 16  ;;  %s1430_s14 = smov [#allocation14]  }
 0x1cd   : > { %p1337_p13 = scmp.ne.s32.totalorder %s1761_s9, %s1336_s26  ;;  %s1340_s11 = sshll.u32 %s1430_s14, 4  ;;  %s1341_s11 = int_to_ptr.vmem [resolvable:$false] %s1340_s11 }
 0x1ce   : > { %s1342_s12 = scalar_lea.vmem %s1341_s11, 32  ;;  %p1343_p11 = scmp.lt.s32.totalorder %s1761_s9, %s1341_s11 }
 0x1cf   : > { %p1338_p0 = pnand %p1337_p13, %p1611_p6  ;;  %p1344_p9 = scmp.lt.s32.totalorder %s1342_s12, %s1336_s26 }
 0x1d1   : > { %p1339_p5 = pneg %p1338_p0  ;;  %p1345_p12 = por %p1344_p9, %p1343_p11 }
 0x1d3   : > { %p1346_p2 = pnand %p1345_p12, %p1339_p5 }
 0x1d5   : > { %1349 = shalt.err (!%p1346_p2)
}
 0x1d6   : > { %s1350_s20 = scalar_lea.hbm %s1759_s8, 16  ;;  %s1354_s15 = scalar_lea.hbm %s1837_s6, 32 }
 0x1d7   : > { %p1351_p1 = scmp.ne.s32.totalorder %s1759_s8, %s1350_s20  ;;  %p1355_p3 = scmp.lt.u32.totalorder %s1759_s8, %s1837_s6 }
 0x1d8   : > { %p1356_p7 = scmp.lt.u32.totalorder %s1354_s15, %s1350_s20  ;;  %p1358_p13 = scmp.lt.u32.totalorder %s1350_s20, %s1759_s8 }
 0x1d9   : > { %p1352_p4 = pnand %p1351_p1, %p1611_p6 }
 0x1da   : > { %p1357_p10 = por %p1356_p7, %p1355_p3 }
 0x1db   : > { %p1353_p8 = pneg %p1352_p4 }
 0x1dc   : > { %p1359_p0 = por %p1358_p13, %p1357_p10 }
 0x1de   : > { %p1360_p5 = pnand %p1359_p0, %p1353_p8 }
 0x1e0   : > { %1363 = shalt.err (!%p1360_p5)
}
 0x1e1   : > { %1063 = dma.vmem_to_hbm [thread:$0]  (%p1611_p6), %s1761_s9, 16, %s1759_s8, %s1763_s19  }
 0x1e2 PF: > { %s764_s25 = sand.u32 1, %s1402_s21   ;;  %p1856_p11 = scmp.ne.s32.totalorder %s1843_s28, 0 }
 0x1e3   : > { %p1857_p9 = scmp.ge.s32.totalorder %s1414_s24, 2  ;;  %s765_s18 = scalar_lea.sflag [#allocation5], %s764_s25 }
 0x1e5   : > { %p1082_p12 = pnand %p1857_p9, %p1856_p11 }
 0x1e7   : > { %1393 = dma.done.wait (!%p1082_p12), %s765_s18, 256  }
 0x1e8   : > { %1395 = vsyncadd (!%p1082_p12), %s765_s18, 4294967040  ;;  %s1858_s29 = sadd.s32 4294967294, %s1414_s24  }
 0x1e9   : > { %s773_s26 = sand.u32 1, %s1858_s29  }
 0x1ea   : > { %s774_s14 = scalar_lea.sflag [#allocation13], %s773_s26 }
 0x1eb   : > { %1397 = dma.done.wait (!%p1082_p12), %s774_s14, 32  }
 0x1ec   : > { %1399 = vsyncadd (!%p1082_p12), %s774_s14, 4294967264  ;;  %p25_p6 = scmp.ge.s32.totalorder %s1597_s13, 4   ;;  %s1859_s21 = smov %s1406_s22 }
 0x1ed   : > { %s1860_s22 = smov %s1410_s23  ;;  %s1861_s23 = smov %s1607_s16 }
 0x1ee   : > { %s1862_s24 = smov %s1597_s13  ;;  %27 = sbr.rel (!%p25_p6) target bundleno = 9 (0x9), region = 127 }
 0x1f5   :  { %786 = vsyncpa [#allocation4], 1 }
 0x1f6   :  { %788 = vsyncpa [#allocation4 + $0x1], 1 }
 0x1f7   :  { %789 = vsyncpa [#allocation7], 1 }
 0x1f8   :  { %790 = vsyncpa [#allocation10], 1 }
 0x1f9   :  { %791 = vsyncpa [#allocation5], 1 }
 0x1fa   :  { %793 = vsyncpa [#allocation5 + $0x1], 1 }
 0x1fb   :  { %794 = vsyncpa [#allocation13], 1 }
 0x1fc   :  { %796 = vsyncpa [#allocation13 + $0x1], 1 }

// kernel: tile.28
= control target key start
LH: loop header
LB: loop body
LE: loop exit
PB: predicated region body
PF: predicated region fallthrough
CT: control target
= control target key end

     0   :  { %2 = vsyncpa [#allocation1], 0  ;;  %s47_s6 = smov [#allocation0]   ;;  %s76_s0 = inlined_call_operand.hbm [shape: f32[8], index: 0, kind: input, shape index: {}]   ;;  %s77_s1 = inlined_call_operand.vmem [shape: f32[16,8], index: 1, kind: output, shape index: {}]  }
   0x1   :  { %s9_s7 = sshll.u32 %s47_s6, 4  ;;  %s23_s10 = scalar_lea.hbm %s76_s0, 16  ;;  %s10_s7 = int_to_ptr.vmem [resolvable:$true] %s9_s7 }
   0x2   :  { %p24_p0 = scmp.ne.s32.totalorder %s76_s0, %s23_s10  ;;  %p27_p1 = scmp.lt.u32.totalorder %s23_s10, %s76_s0 }
   0x4   :  { %p29_p2 = pnand %p27_p1, %p24_p0 }
   0x6   :  { %32 = shalt.err (!%p29_p2)
}
   0x7   :  { %s33_s15 = scalar_lea.vmem %s10_s7, 16  ;;  %s37_s16 = scalar_lea.vmem %s10_s7, 32 }
   0x8   :  { %p34_p3 = scmp.ne.s32.totalorder %s10_s7, %s33_s15  ;;  %p38_p4 = scmp.lt.s32.totalorder %s10_s7, %s10_s7 }
   0x9   :  { %p39_p5 = scmp.lt.s32.totalorder %s37_s16, %s33_s15 }
   0xb   :  { %p40_p6 = por %p39_p5, %p38_p4 }
   0xd   :  { %p41_p7 = pnand %p40_p6, %p34_p3 }
   0xf   :  { %44 = shalt.err (!%p41_p7)
}
  0x10   :  { %12 = dma.hbm_to_vmem [thread:$0]  %s76_s0, 16, %s10_s7, [#allocation1]  }
  0x11   :  { %45 = dma.done.wait [#allocation1], 16  }
  0x12   :  { %46 = vsyncadd [#allocation1], 4294967280  ;;  %v16_v0 = vld [vmem:[#allocation0] ss:$0 sm:$0xff] }
  0x13   :  { %17 = vst [vmem:[%s77_s1] sm:$0xff] %v16_v0  ;;  %21 = vst [vmem:[%s77_s1 + $0x8] sm:$0xff] %v16_v0 }
  0x14   :  { %20 = vsyncpa [#allocation1], 1 }

// kernel: resnet_block.5
= control target key start
LH: loop header
LB: loop body
LE: loop exit
PB: predicated region body
PF: predicated region fallthrough
CT: control target
= control target key end

     0   :  { %s1430_s0 = inlined_call_operand.hbm [shape: f32[2,16,128], index: 0, kind: input, shape index: {}]   ;;  %s1431_s1 = inlined_call_operand.hbm [shape: f32[2,18,64], index: 1, kind: input, shape index: {}]   ;;  %s1432_s2 = inlined_call_operand.hbm [shape: bf16[64,128], index: 2, kind: input, shape index: {}]   ;;  %s1433_s3 = inlined_call_operand.hbm [shape: f32[1,128], index: 3, kind: input, shape index: {}]   ;;  %s1434_s4 = inlined_call_operand.hbm [shape: f32[1,128], index: 4, kind: input, shape index: {}]   ;;  %s1435_s5 = inlined_call_operand.hbm [shape: f32[1,128], index: 5, kind: input, shape index: {}]   ;;  %s1436_s6 = inlined_call_operand.hbm [shape: f32[2,16,128], index: 6, kind: output, shape index: {}]  }
   0x1   :  { %1440 = sst [smem:[#allocation20_spill]] %s1430_s0 }
   0x2   :  { %1441 = sst [smem:[#allocation21_spill]] %s1432_s2 }
   0x3   :  { %1442 = sst [smem:[#allocation22_spill]] %s1433_s3 }
   0x4   :  { %1443 = sst [smem:[#allocation23_spill]] %s1434_s4 }
   0x5   :  { %11 = vsyncpa [#allocation3], 0 }
   0x6   :  { %13 = vsyncpa [#allocation3 + $0x1], 0 }
   0x7   :  { %14 = vsyncpa [#allocation6], 0 }
   0x8   :  { %16 = vsyncpa [#allocation6 + $0x1], 0 }
   0x9   :  { %17 = vsyncpa [#allocation9], 0 }
   0xa   :  { %18 = vsyncpa [#allocation12], 0 }
   0xb   :  { %19 = vsyncpa [#allocation4], 0 }
   0xc   :  { %21 = vsyncpa [#allocation4 + $0x1], 0  ;;  %s1087_s21 = smov 0   ;;  %s1089_s22 = smov 0  }
   0xd   :  { %s1091_s23 = smov 0   ;;  %s1093_s24 = smov 0  }
   0xe LB: > { %s1108_s25 = sadd.s32 4294967295, %s1035_s24   ;;  %s624_s26 = sadd.s32 4294967294, %s1035_s24   ;;  %s1035_s24 = sphi %s1093_s24, %s1470_s24   ;;  %s1031_s23 = sphi %s1091_s23, %s1469_s23   ;;  %s1027_s22 = sphi %s1089_s22, %s1468_s22   ;;  %s1023_s21 = sphi %s1087_s21, %s1467_s21  }
   0xf   : > { %p47_p0 = scmp.ne.s32.totalorder %s1027_s22, %s1023_s21  ;;  %p1437_p1 = scmp.eq.s32.totalorder %s1108_s25, 0 }
  0x10   : > { %p187_p3 = scmp.eq.s32.totalorder %s624_s26, 1  ;;  %p625_p5 = scmp.ge.s32.totalorder %s1035_s24, 1 }
  0x11   : > { %p1117_p4 = por %p1437_p1, %p47_p0  ;;  %p194_p7 = scmp.lt.s32.totalorder %s1035_s24, 3 }
  0x12   : > { %p1122_p6 = por %p187_p3, %p47_p0  ;;  %s1037_s30 = smov [#allocation7]  }
  0x13   : > { %s1444_s27 = scalar_select %p1117_p4, 1, 0 }
  0x14   : > { %s1445_s28 = scalar_select %p1122_p6, 1, 0 }
  0x15   : > { %p1127_p8 = pnand %p625_p5, %p194_p7  ;;  %s206_s7 = sshll.u32 %s1037_s30, 4  ;;  %s1131_s7 = int_to_ptr.vmem [resolvable:$true] %s206_s7 }
  0x16   : > { %s1038_s9 = smov [#allocation8]   ;;  %s1039_s11 = smov [#allocation10]  }
  0x17   : > { %s1446_s29 = scalar_select %p1127_p8, 1, 0 }
  0x18   : > { %p699_p9 = pneg %p1127_p8  ;;  %s220_s10 = sshll.u32 %s1038_s9, 4  ;;  %s1142_s10 = int_to_ptr.vmem [resolvable:$true] %s220_s10 }
  0x19   : > { %s1144_s12 = sshll.u32 %s1039_s11, 4  ;;  %s1448_s2 = sld [smem:[#allocation21_spill]]  ;;  %s232_s12 = int_to_ptr.vmem [resolvable:$true] %s1144_s12 }
  0x1a   : > { %p1138_p11 = pnand %p699_p9, %p1437_p1 }
  0x1c   : > { %p1154_p13 = pneg %p1138_p11 }
  0x1f   : > { %s781_s15 = scalar_lea.hbm %s1448_s2, 512 }
  0x20   : > { %p782_p12 = scmp.ne.s32.totalorder %s1448_s2, %s781_s15  ;;  %p788_p5 = scmp.lt.u32.totalorder %s781_s15, %s1448_s2 }
  0x22   : > { %p784_p0 = pnand %p1154_p13, %p782_p12 }
  0x24   : > { %p785_p3 = pneg %p784_p0 }
  0x26   : > { %p790_p7 = pnand %p788_p5, %p785_p3 }
  0x28   : > { %793 = shalt.err (!%p790_p7)
}
  0x29   : > { %s794_s26 = scalar_lea.vmem %s1131_s7, 512  ;;  %p802_p2 = scmp.lt.s32.totalorder %s1131_s7, %s1131_s7 }
  0x2a   : > { %p795_p9 = scmp.ne.s32.totalorder %s1131_s7, %s794_s26  ;;  %p803_p6 = scmp.lt.s32.totalorder %s794_s26, %s794_s26 }
  0x2c   : > { %p797_p10 = pnand %p795_p9, %p1154_p13  ;;  %p804_p12 = por %p803_p6, %p802_p2 }
  0x2e   : > { %p798_p1 = pneg %p797_p10 }
  0x30   : > { %p805_p0 = pnand %p804_p12, %p798_p1 }
  0x32   : > { %808 = shalt.err (!%p805_p0)
}
  0x33   : > { %s1040_s30 = smov 64   ;;  %s1041_s9 = smov 4  }
  0x34   : > { %702 = dma.hbm_to_vmem [thread:$0]  (!%p1138_p11), %s1448_s2, 512, %s1131_s7, [#allocation6], %s1040_s30, %s1040_s30, %s1041_s9  }
  0x35   : > { %s1450_s3 = sld [smem:[#allocation22_spill]] }
  0x3b   : > { %s809_s16 = scalar_lea.hbm %s1450_s3, 16 }
  0x3c   : > { %p810_p2 = scmp.ne.s32.totalorder %s1450_s3, %s809_s16  ;;  %p816_p10 = scmp.lt.u32.totalorder %s809_s16, %s1450_s3 }
  0x3e   : > { %p812_p1 = pnand %p810_p2, %p1154_p13 }
  0x40   : > { %p813_p6 = pneg %p812_p1 }
  0x42   : > { %p818_p3 = pnand %p816_p10, %p813_p6 }
  0x44   : > { %821 = shalt.err (!%p818_p3)
}
  0x45   : > { %s822_s7 = scalar_lea.vmem %s1142_s10, 16  ;;  %s829_s30 = scalar_lea.vmem %s1142_s10, 32 }
  0x46   : > { %p823_p5 = scmp.ne.s32.totalorder %s1142_s10, %s822_s7  ;;  %p830_p12 = scmp.lt.s32.totalorder %s1142_s10, %s1142_s10 }
  0x47   : > { %p831_p0 = scmp.lt.s32.totalorder %s829_s30, %s822_s7 }
  0x48   : > { %p825_p7 = pnand %p823_p5, %p1154_p13 }
  0x49   : > { %p832_p2 = por %p831_p0, %p830_p12 }
  0x4a   : > { %p826_p9 = pneg %p825_p7 }
  0x4c   : > { %p833_p1 = pnand %p832_p2, %p826_p9 }
  0x4e   : > { %836 = shalt.err (!%p833_p1)
}
  0x4f   : > { %705 = dma.hbm_to_vmem [thread:$0]  (!%p1138_p11), %s1450_s3, 16, %s1142_s10, [#allocation9]  }
  0x50   : > { %s1451_s4 = sld [smem:[#allocation23_spill]] }
  0x56   : > { %s837_s15 = scalar_lea.hbm %s1451_s4, 16 }
  0x57   : > { %p838_p6 = scmp.ne.s32.totalorder %s1451_s4, %s837_s15  ;;  %p844_p5 = scmp.lt.u32.totalorder %s837_s15, %s1451_s4 }
  0x59   : > { %p840_p10 = pnand %p838_p6, %p1154_p13 }
  0x5b   : > { %p841_p3 = pneg %p840_p10 }
  0x5d   : > { %p846_p7 = pnand %p844_p5, %p841_p3 }
  0x5f   : > { %849 = shalt.err (!%p846_p7)
}
  0x60   : > { %s850_s26 = scalar_lea.vmem %s232_s12, 16  ;;  %s857_s10 = scalar_lea.vmem %s232_s12, 32 }
  0x61   : > { %p851_p9 = scmp.ne.s32.totalorder %s232_s12, %s850_s26  ;;  %p858_p2 = scmp.lt.s32.totalorder %s232_s12, %s232_s12 }
  0x62   : > { %p859_p1 = scmp.lt.s32.totalorder %s857_s10, %s850_s26 }
  0x63   : > { %p853_p12 = pnand %p851_p9, %p1154_p13 }
  0x64   : > { %p860_p4 = por %p859_p1, %p858_p2 }
  0x65   : > { %p854_p0 = pneg %p853_p12 }
  0x67   : > { %p861_p8 = pnand %p860_p4, %p854_p0 }
  0x69   : > { %864 = shalt.err (!%p861_p8)
}
  0x6a   : > { %708 = dma.hbm_to_vmem [thread:$0]  (!%p1138_p11), %s1451_s4, 16, %s232_s12, [#allocation9]  }
  0x6b   : > { %s1042_s9 = smov [#allocation11]   ;;  %s865_s15 = scalar_lea.hbm %s1435_s5, 16 }
  0x6c   : > { %s242_s11 = sshll.u32 %s1042_s9, 4  ;;  %p866_p6 = scmp.ne.s32.totalorder %s1435_s5, %s865_s15  ;;  %s243_s11 = int_to_ptr.vmem [resolvable:$true] %s242_s11 }
  0x6d   : > { %p872_p10 = scmp.lt.u32.totalorder %s865_s15, %s1435_s5 }
  0x6e   : > { %p868_p4 = pnand %p866_p6, %p1154_p13 }
  0x70   : > { %p869_p8 = pneg %p868_p4 }
  0x72   : > { %p874_p3 = pnand %p872_p10, %p869_p8 }
  0x74   : > { %877 = shalt.err (!%p874_p3)
}
  0x75   : > { %s878_s12 = scalar_lea.vmem %s243_s11, 16  ;;  %s885_s26 = scalar_lea.vmem %s243_s11, 32 }
  0x76   : > { %p879_p5 = scmp.ne.s32.totalorder %s243_s11, %s878_s12  ;;  %p886_p12 = scmp.lt.s32.totalorder %s243_s11, %s243_s11 }
  0x77   : > { %p887_p0 = scmp.lt.s32.totalorder %s885_s26, %s878_s12 }
  0x78   : > { %p881_p7 = pnand %p879_p5, %p1154_p13 }
  0x79   : > { %p888_p2 = por %p887_p0, %p886_p12 }
  0x7a   : > { %p882_p9 = pneg %p881_p7 }
  0x7c   : > { %p889_p1 = pnand %p888_p2, %p882_p9 }
  0x7e   : > { %892 = shalt.err (!%p889_p1)
}
  0x7f   : > { %711 = dma.hbm_to_vmem [thread:$0]  (!%p1138_p11), %s1435_s5, 16, %s243_s11, [#allocation12]  }
  0x80   : > { %s1237_s18 = sadd.s32 1, %s1035_s24   ;;  %s34_s30 = sadd.s32 1, %s1031_s23 }
  0x81   : > { %s31_s8 = ssub.s32 %s1035_s24, %s1237_s18  ;;  %p41_p13 = scmp.ne.s32.totalorder %s1031_s23, %s1027_s22 }
  0x82   : > { %p32_p6 = scmp.eq.s32.totalorder %s31_s8, 0  ;;  %p42_p4 = scmp.eq.s32.totalorder %s1035_s24, 0 }
  0x83   : > { %p1452_p8 = scmp.eq.s32.totalorder %s1108_s25, 1  ;;  %p727_p3 = scmp.lt.s32.totalorder %s1035_s24, 2 }
  0x84   : > { %s1253_s13 = scalar_select %p32_p6, %s1031_s23, %s34_s30  }
  0x85   : > { %p1247_p10 = por %p1452_p8, %p41_p13  ;;  %p43_p5 = por %p42_p4, %p41_p13 }
  0x86   : > { %s1256_s14 = sand.u32 1, %s1031_s23   ;;  %s655_s15 = sshll.u32 %s1035_s24, 8 }
  0x87   : > { %s631_s11 = sshll.u32 %s1256_s14, 4  ;;  %s1454_s0 = sld [smem:[#allocation20_spill]] }
  0x88   : > { %s257_s20 = scalar_lea.vmem [#allocation2], %s631_s11  ;;  %p1267_p11 = pnand %p727_p3, %p43_p5 }
  0x89   : > { %s264_s12 = sshll.u32 %s257_s20, 4  ;;  %s254_s7 = scalar_lea.sflag [#allocation3], %s1256_s14  ;;  %s1265_s12 = int_to_ptr.vmem [resolvable:$true] %s264_s12 }
  0x8a   : > { %p895_p9 = pneg %p1267_p11 }
  0x8d   : > { %s1263_s19 = scalar_lea.hbm %s1454_s0, %s655_s15  ;;  %s898_s15 = scalar_lea.hbm %s1454_s0, 512 }
  0x8e   : > { %s893_s30 = scalar_lea.hbm %s1263_s19, 256  ;;  %p899_p2 = scmp.lt.u32.totalorder %s1263_s19, %s1454_s0 }
  0x8f   : > { %p894_p7 = scmp.ne.s32.totalorder %s1263_s19, %s893_s30  ;;  %p900_p1 = scmp.lt.u32.totalorder %s898_s15, %s893_s30 }
  0x90   : > { %p902_p6 = scmp.lt.u32.totalorder %s893_s30, %s1263_s19 }
  0x91   : > { %p896_p12 = pnand %p895_p9, %p894_p7  ;;  %p901_p13 = por %p900_p1, %p899_p2 }
  0x93   : > { %p897_p0 = pneg %p896_p12  ;;  %p903_p4 = por %p902_p6, %p901_p13 }
  0x95   : > { %p904_p8 = pnand %p903_p4, %p897_p0 }
  0x97   : > { %907 = shalt.err (!%p904_p8)
}
  0x98   : > { %s908_s20 = scalar_lea.vmem %s1265_s12, 256  ;;  %s1043_s8 = smov [#allocation2]  }
  0x99   : > { %p909_p3 = scmp.ne.s32.totalorder %s1265_s12, %s908_s20  ;;  %s913_s11 = sshll.u32 %s1043_s8, 4  ;;  %s914_s11 = int_to_ptr.vmem [resolvable:$false] %s913_s11 }
  0x9a   : > { %s915_s16 = scalar_lea.vmem %s914_s11, 512  ;;  %p916_p12 = scmp.lt.s32.totalorder %s1265_s12, %s914_s11 }
  0x9b   : > { %p911_p5 = pnand %p909_p3, %p895_p9  ;;  %p917_p2 = scmp.lt.s32.totalorder %s915_s16, %s908_s20 }
  0x9d   : > { %p912_p7 = pneg %p911_p5  ;;  %p918_p1 = por %p917_p2, %p916_p12 }
  0x9f   : > { %p919_p13 = pnand %p918_p1, %p912_p7 }
  0xa1   : > { %922 = shalt.err (!%p919_p13)
}
  0xa2   : > { %s1044_s30 = smov 128   ;;  %s1045_s15 = smov 8  }
  0xa3   : > { %715 = dma.hbm_to_vmem [thread:$0]  (!%p1267_p11), %s1263_s19, 256, %s1265_s12, %s254_s7, %s1044_s30, %s1044_s30, %s1045_s15  }
  0xa4   : > { %s674_s17 = smul.u32 24, %s1256_s14  ;;  %s1456_s2 = sand.u32 1, %s1035_s24  }
  0xa5   : > { %s675_s20 = smul.u32 384, %s1035_s24  ;;  %s1314_s3 = scalar_lea.sflag [#allocation6], %s1456_s2 }
  0xa6   : > { %s278_s10 = scalar_lea.vmem [#allocation5], %s674_s17  ;;  %s928_s12 = scalar_lea.hbm %s1431_s1, 768 }
  0xa7   : > { %s1308_s16 = scalar_lea.hbm %s1431_s1, %s675_s20  ;;  %s285_s0 = sshll.u32 %s278_s10, 4  ;;  %s1310_s0 = int_to_ptr.vmem [resolvable:$true] %s285_s0 }
  0xa8   : > { %s923_s4 = scalar_lea.hbm %s1308_s16, 384  ;;  %p929_p8 = scmp.lt.u32.totalorder %s1308_s16, %s1431_s1 }
  0xa9   : > { %p924_p0 = scmp.ne.s32.totalorder %s1308_s16, %s923_s4  ;;  %p930_p3 = scmp.lt.u32.totalorder %s928_s12, %s923_s4 }
  0xaa   : > { %p932_p7 = scmp.lt.u32.totalorder %s923_s4, %s1308_s16 }
  0xab   : > { %p926_p6 = pnand %p924_p0, %p895_p9  ;;  %p931_p5 = por %p930_p3, %p929_p8 }
  0xad   : > { %p927_p4 = pneg %p926_p6  ;;  %p933_p12 = por %p932_p7, %p931_p5 }
  0xaf   : > { %p934_p2 = pnand %p933_p12, %p927_p4 }
  0xb1   : > { %937 = shalt.err (!%p934_p2)
}
  0xb2   : > { %s938_s2 = scalar_lea.vmem %s1310_s0, 384  ;;  %s1046_s10 = smov [#allocation5]  }
  0xb3   : > { %p939_p1 = scmp.ne.s32.totalorder %s1310_s0, %s938_s2  ;;  %s943_s17 = sshll.u32 %s1046_s10, 4  ;;  %s944_s17 = int_to_ptr.vmem [resolvable:$false] %s943_s17 }
  0xb4   : > { %s945_s8 = scalar_lea.vmem %s944_s17, 768  ;;  %p946_p6 = scmp.lt.s32.totalorder %s1310_s0, %s944_s17 }
  0xb5   : > { %p941_p13 = pnand %p939_p1, %p895_p9  ;;  %p947_p8 = scmp.lt.s32.totalorder %s945_s8, %s938_s2 }
  0xb7   : > { %p942_p0 = pneg %p941_p13  ;;  %p948_p3 = por %p947_p8, %p946_p6 }
  0xb9   : > { %p949_p5 = pnand %p948_p3, %p942_p0 }
  0xbb   : > { %952 = shalt.err (!%p949_p5)
}
  0xbc   : > { %718 = dma.hbm_to_vmem [thread:$0]  (!%p1267_p11), %s1308_s16, 384, %s1310_s0, %s1314_s3, %s1044_s30, %s1044_s30, %s1045_s15  }
  0xbd   : > { %p1457_p9 = scmp.ne.s32.totalorder %s1446_s29, 0 }
  0xbe   : > { %s1346_s4 = sand.u32 (!%p1457_p9), 1, %s1027_s22   ;;  %p1458_p4 = scmp.ne.s32.totalorder (!%p1457_p9), %s1444_s27, 0 }
  0xbf   : > { %297 = sbr.rel (%p1457_p9) target bundleno = 465 (0x1d1), region = 44  ;;  %s636_s11 = sshll.u32 (!%p1457_p9), %s1346_s4, 4 }
  0xc0   : > { %s300_s14 = scalar_lea.sflag (!%p1457_p9), [#allocation3], %s1346_s4  ;;  %s1352_s26 = scalar_lea.vmem (!%p1457_p9), [#allocation2], %s636_s11 }
  0xc6   : > { %998 = dma.done.wait (%p1458_p4), %s300_s14, 256  }
  0xc7   : > { %1000 = vsyncadd (%p1458_p4), %s300_s14, 4294967040  ;;  %s308_s0 = sand.u32 1, %s1108_s25   ;;  %s676_s3 = smul.u32 24, %s1346_s4 }
  0xc8   : > { %s309_s29 = scalar_lea.sflag [#allocation6], %s308_s0 }
  0xc9   : > { %s312_s30 = scalar_lea.vmem [#allocation5], %s676_s3 }
  0xca   : > { %1002 = dma.done.wait (%p1458_p4), %s309_s29, 384  }
  0xcb   : > { %1004 = vsyncadd (%p1458_p4), %s309_s29, 4294966912  ;;  %p1459_p11 = scmp.eq.s32.totalorder %s1108_s25, 0 }
  0xcd   : > { %1006 = dma.done.wait (%p1459_p11), [#allocation6], 512   ;;  %p1460_p7 = pmov %p1459_p11 }
  0xcf   : > { %1008 = vsyncadd (%p1460_p7), [#allocation6], 4294966784  ;;  %p1461_p12 = pmov %p1460_p7 }
  0xd0   : > { %p1462_p2 = pmov %p1460_p7 }
  0xd1   : > { %1010 = dma.done.wait (%p1461_p12), [#allocation9], 32  }
  0xd2   : > { %1012 = vsyncadd (%p1462_p2), [#allocation9], 4294967264  ;;  %p1463_p1 = pmov %p1462_p2 }
  0xd4   : > { %1014 = dma.done.wait (%p1463_p1), [#allocation12], 16   ;;  %p1464_p13 = pmov %p1463_p1 }
  0xd5   : > { %v1047_v0 = vmov 0.0   ;;  %vm1048_vm0 = vmmov 0   ;;  %v777_v1 = vld [vmem:[#allocation7] sm:$0xff]   ;;  %v778_v2 = vld [vmem:[#allocation7 + $0x8] sm:$0xff]   ;;  %v779_v3 = vld [vmem:[#allocation7 + $0x10] sm:$0xff]   ;;  %vm405_vm1 = vcmask 523264  }
  0xd6   : > { %1016 = vsyncadd (%p1464_p13), [#allocation12], 4294967280  ;;  %662 = vmatprep.subr.bf16.mxu0 %v1047_v0  ;;  %670 = vmatprep.mubr.msk.bf16.mxu0 %vm1048_vm0, %v1047_v0  ;;  %v780_v4 = vld [vmem:[#allocation7 + $0x18] sm:$0xff]   ;;  %v450_v8 = vld [vmem:[%s1352_s26] sm:$0xff]  ;;  %s361_s27 = scalar_lea.vmem [#allocation13], %s636_s11  ;;  %s656_s16 = sshll.u32 %s1108_s25, 8 }
  0xd7   : > { %663 = vmatpush3.bf16.msra.mxu0 %v777_v1  ;;  %v363_v5 = vld [vmem:[%s312_s30 + $0x1] sm:$0xff]  ;;  %v364_v6 = vld [vmem:[%s312_s30 + $0x9] sm:$0xff]  ;;  %v648_v9 = vld [vmem:[#allocation10] ss:$0 sm:$0xff]  ;;  %s490_s15 = sshll.u32 %s361_s27, 4  ;;  %s1386_s7 = scalar_lea.hbm %s1436_s6, %s656_s16  ;;  %s1381_s15 = int_to_ptr.vmem [resolvable:$true] %s490_s15 }
  0xd8   : > { %664 = vmatprep.subr.bf16.mxu0 %v1047_v0  ;;  %v365_v7 = vpack.c.bf16 %v364_v6, %v363_v5  ;;  %v451_v10 = vld [vmem:[%s1352_s26 + $0x8] sm:$0xff]  ;;  %v459_v11 = vmul.f32 %v648_v9, %v450_v8  ;;  %v649_v12 = vld [vmem:[#allocation11] ss:$0 sm:$0xff]  ;;  %v642_v14 = vld [vmem:[#allocation8] ss:$0 sm:$0xff]  ;;  %s477_s20 = scalar_lea.sflag [#allocation4], %s1346_s4 }
  0xd9   : > { %v460_v13 = vmul.f32 %v648_v9, %v451_v10  ;;  %s953_s2 = scalar_lea.vmem %s1381_s15, 256  ;;  %s1049_s25 = smov [#allocation13]  }
  0xda   : > { %v468_v15 = vadd.f32 %v649_v12, %v459_v11  ;;  %p954_p0 = scmp.ne.s32.totalorder %s1381_s15, %s953_s2  ;;  %s957_s10 = sshll.u32 %s1049_s25, 4  ;;  %s958_s10 = int_to_ptr.vmem [resolvable:$false] %s957_s10 }
  0xdb   : > { %665 = vmatpush3.bf16.msra.mxu0 %v778_v2  ;;  %v469_v19 = vadd.f32 %v649_v12, %v460_v13  ;;  %s959_s17 = scalar_lea.vmem %s958_s10, 512  ;;  %p960_p3 = scmp.lt.s32.totalorder %s1381_s15, %s958_s10 }
  0xdc   : > { %666 = vmatprep.subr.bf16.mxu0 %v1047_v0  ;;  %p955_p6 = pnand %p954_p0, %p1247_p10  ;;  %p961_p5 = scmp.lt.s32.totalorder %s959_s17, %s953_s2 }
  0xde   : > { %p956_p8 = pneg %p955_p6  ;;  %p962_p9 = por %p961_p5, %p960_p3 }
  0xdf   : > { %667 = vmatpush3.bf16.msra.mxu0 %v779_v3 }
  0xe0   : > { %668 = vmatprep.subr.bf16.mxu0 %v1047_v0  ;;  %p963_p4 = pnand %p962_p9, %p956_p8 }
  0xe3   : > { %669 = vmatpush3.bf16.msra.mxu0 %v780_v4 }
  0xe6   : > { %671 = vmatmul.mubr.msk.bf16.vlgmr.msra.gmra.mrb[0].mxu0 %vm405_vm1, %v365_v7 }
 0x1b9   : > { %v443_v16 = vpop.f32.mrb[0].mxu0 }
 0x1ba   : > { %v444_v17 = vadd.f32 %v642_v14, %v443_v16  ;;  %v672_v18 = vpop.f32.mrb[1].mxu0 }
 0x1bb   : > { %v446_v20 = vpop.f32.mrb[2].mxu0 }
 0x1bc   : > { %v470_v21 = vadd.f32 %v468_v15, %v444_v17  ;;  %v447_v22 = vadd.f32 %v642_v14, %v446_v20  ;;  %v673_v23 = vpop.f32.mrb[3].mxu0 }
 0x1be   : > { %v472_v24 = vmax.f32 %v470_v21, 0.0  ;;  %v471_v25 = vadd.f32 %v469_v19, %v447_v22 }
 0x1c0   : > { %474 = vst [vmem:[%s361_s27] sm:$0xff] %v472_v24  ;;  %v473_v26 = vmax.f32 %v471_v25, 0.0 }
 0x1c2   : > { %475 = vst [vmem:[%s361_s27 + $0x8] sm:$0xff] %v473_v26 }
 0x1c3   : > { %966 = shalt.err (!%p963_p4)
}
 0x1c4   : > { %s967_s8 = scalar_lea.hbm %s1386_s7, 256  ;;  %s971_s26 = scalar_lea.hbm %s1436_s6, 512 }
 0x1c5   : > { %p968_p11 = scmp.ne.s32.totalorder %s1386_s7, %s967_s8  ;;  %p972_p2 = scmp.lt.u32.totalorder %s1386_s7, %s1436_s6 }
 0x1c6   : > { %p973_p1 = scmp.lt.u32.totalorder %s971_s26, %s967_s8  ;;  %p975_p0 = scmp.lt.u32.totalorder %s967_s8, %s1386_s7 }
 0x1c7   : > { %p969_p7 = pnand %p968_p11, %p1247_p10 }
 0x1c8   : > { %p974_p13 = por %p973_p1, %p972_p2 }
 0x1c9   : > { %p970_p12 = pneg %p969_p7 }
 0x1ca   : > { %p976_p6 = por %p975_p0, %p974_p13 }
 0x1cc   : > { %p977_p8 = pnand %p976_p6, %p970_p12 }
 0x1ce   : > { %980 = shalt.err (!%p977_p8)
}
 0x1cf   : > { %s1050_s29 = smov 128   ;;  %s1051_s30 = smov 8  }
 0x1d0   : > { %697 = dma.vmem_to_hbm [thread:$0]  (%p1247_p10), %s1381_s15, 256, %s1386_s7, %s477_s20, %s1050_s29, %s1050_s29, %s1051_s30  }
 0x1d1 PF: > { %s505_s27 = sand.u32 1, %s1023_s21   ;;  %p1465_p3 = scmp.ne.s32.totalorder %s1445_s28, 0 }
 0x1d2   : > { %p1466_p5 = scmp.ge.s32.totalorder %s1035_s24, 2  ;;  %s506_s16 = scalar_lea.sflag [#allocation4], %s505_s27 }
 0x1d4   : > { %p720_p9 = pnand %p1466_p5, %p1465_p3 }
 0x1d6   : > { %1018 = dma.done.wait (!%p720_p9), %s506_s16, 256  }
 0x1d7   : > { %1020 = vsyncadd (!%p720_p9), %s506_s16, 4294967040  ;;  %p24_p4 = scmp.ge.s32.totalorder %s1237_s18, 4   ;;  %s1467_s21 = smov %s1027_s22 }
 0x1d8   : > { %s1468_s22 = smov %s1031_s23  ;;  %s1469_s23 = smov %s1253_s13 }
 0x1d9   : > { %s1470_s24 = smov %s1237_s18  ;;  %26 = sbr.rel (!%p24_p4) target bundleno = 14 (0xe), region = 118 }
 0x1e0   :  { %511 = vsyncpa [#allocation3], 1 }
 0x1e1   :  { %513 = vsyncpa [#allocation3 + $0x1], 1 }
 0x1e2   :  { %514 = vsyncpa [#allocation6], 1 }
 0x1e3   :  { %516 = vsyncpa [#allocation6 + $0x1], 1 }
 0x1e4   :  { %517 = vsyncpa [#allocation9], 1 }
 0x1e5   :  { %518 = vsyncpa [#allocation12], 1 }
 0x1e6   :  { %519 = vsyncpa [#allocation4], 1 }
 0x1e7   :  { %521 = vsyncpa [#allocation4 + $0x1], 1 }

</bundles_post_ra>
